<compile_context>
chip_gen: v5e
topology: v5e:2x2
jax: 0.10.0
libtpu: 0.0.40
codegen_flags: <defaults>
</compile_context>

<pallas_src>
from functools import partial

import jax
import jax.numpy as jnp
from jax.experimental import pallas as pl
from jax.experimental.pallas import tpu as pltpu


# --------------------------- fused Pallas kernel ---------------------------
def fused_layers_kernel(x_ref,
                        ln1_w_ref, ln1_b_ref,
                        in_w_ref, in_b_ref,          # [3H, E, D], [3H, 1, D]
                        wo_ref, out_b_ref,           # [H, D, E],  [1, E]
                        ln2_w_ref, ln2_b_ref,
                        w1_ref, b1_ref,              # [E, hidden], [1, hidden]
                        w2_ref, b2_ref,              # [hidden, E], [1, E]
                        o_ref, x_acc, *, heads):
    l = pl.program_id(0)
    n_layers = pl.num_programs(0)
    eps = 1e-5  # PyTorch layer_norm_eps default

    @pl.when(l == 0)
    def _():
        x_acc[...] = x_ref[...].astype(jnp.float32)

    x = x_acc[...]

    def layer_norm(v, w, b):
        mu = jnp.mean(v, axis=-1, keepdims=True)
        var = jnp.mean((v - mu) ** 2, axis=-1, keepdims=True)
        return (v - mu) * jax.lax.rsqrt(var + eps) * w + b

    # ---- self-attention block (pre-norm); 1/sqrt(D) folded into Wq/bq ----
    xn = layer_norm(x, ln1_w_ref[...], ln1_b_ref[...])
    attn = None
    for h in range(heads):  # static unroll; all indices are leading-dim, aligned
        qh = jnp.dot(xn, in_w_ref[h],
                     preferred_element_type=jnp.float32) + in_b_ref[h]
        kh = jnp.dot(xn, in_w_ref[heads + h],
                     preferred_element_type=jnp.float32) + in_b_ref[heads + h]
        vh = jnp.dot(xn, in_w_ref[2 * heads + h],
                     preferred_element_type=jnp.float32) + in_b_ref[2 * heads + h]
        # scores = qh @ kh^T without materializing a transpose
        s = jax.lax.dot_general(qh, kh, (((1,), (1,)), ((), ())),
                                preferred_element_type=jnp.float32)   # [N, N]
        s = s - jnp.max(s, axis=-1, keepdims=True)
        p = jnp.exp(s)
        p = p * pl.reciprocal(jnp.sum(p, axis=-1, keepdims=True), approx=True)
        hv = jnp.dot(p, vh, preferred_element_type=jnp.float32)       # [N, D]
        contrib = jnp.dot(hv, wo_ref[h],
                          preferred_element_type=jnp.float32)         # [N, E]
        attn = contrib if attn is None else attn + contrib
    x = x + attn + out_b_ref[...]

    # ---- feed-forward block (pre-norm) ----
    xn2 = layer_norm(x, ln2_w_ref[...], ln2_b_ref[...])
    h1 = jnp.dot(xn2, w1_ref[...], preferred_element_type=jnp.float32) + b1_ref[...]
    h1 = jnp.maximum(h1, 0.0)                                          # relu (PyTorch default)
    ff = jnp.dot(h1, w2_ref[...], preferred_element_type=jnp.float32) + b2_ref[...]
    x = x + ff

    x_acc[...] = x

    @pl.when(l == n_layers - 1)
    def _():
        o_ref[...] = x.astype(o_ref.dtype)


# ------------------ host-side weight packing (layout only) ------------------
def pack_params(params, heads):
    """PyTorch-layout per-layer dicts -> stacked, pre-transposed, per-head arrays."""
    E = params[0]["ln1_w"].shape[-1]
    D = E // heads
    scale = 1.0 / float(D) ** 0.5

    def per_layer(p):
        # in_proj_weight [3E, E] -> per-head Wq/Wk/Wv as [E, D] (x @ W), scale in Wq
        in_w = p["in_w"].reshape(3, heads, D, E).transpose(0, 1, 3, 2)   # [3,H,E,D]
        in_w = in_w.at[0].multiply(scale)
        in_b = p["in_b"].reshape(3, heads, D)
        in_b = in_b.at[0].multiply(scale)
        # out_proj.weight [E, E]: concat-heads @ W^T  ->  per-head Wo_h [D, E]
        wo = p["out_w"].T.reshape(heads, D, E)
        return dict(
            ln1_w=p["ln1_w"], ln1_b=p["ln1_b"],
            in_w=in_w.reshape(3 * heads, E, D),
            in_b=in_b.reshape(3 * heads, 1, D),
            wo=wo, out_b=p["out_b"],
            ln2_w=p["ln2_w"], ln2_b=p["ln2_b"],
            w1=p["lin1_w"].T, b1=p["lin1_b"],
            w2=p["lin2_w"].T, b2=p["lin2_b"],
        )

    per = [per_layer(p) for p in params]
    return {k: jnp.stack([q[k] for q in per], axis=0) for k in per[0]}


# ------------------------------- wrapper -------------------------------
def transformer_interactor(x, params, heads):
    """x: [n_object, input_size] -> [n_object, input_size]"""
    w = pack_params(params, heads)
    N, E = x.shape
    L = w["ln1_w"].shape[0]
    H = heads
    D = E // heads
    hidden = w["w1"].shape[-1]

    lm3 = lambda l: (l, 0, 0)
    lm4 = lambda l: (l, 0, 0, 0)

    in_specs = [
        pl.BlockSpec((N, E), lambda l: (0, 0)),           # x (resident)
        pl.BlockSpec((None, 1, E), lm3),                  # ln1_w
        pl.BlockSpec((None, 1, E), lm3),                  # ln1_b
        pl.BlockSpec((None, 3 * H, E, D), lm4),           # in_w (per-head, pre-T)
        pl.BlockSpec((None, 3 * H, 1, D), lm4),           # in_b (per-head)
        pl.BlockSpec((None, H, D, E), lm4),               # wo (per-head, pre-T)
        pl.BlockSpec((None, 1, E), lm3),                  # out_b
        pl.BlockSpec((None, 1, E), lm3),                  # ln2_w
        pl.BlockSpec((None, 1, E), lm3),                  # ln2_b
        pl.BlockSpec((None, E, hidden), lm3),             # w1 (pre-T)
        pl.BlockSpec((None, 1, hidden), lm3),             # b1
        pl.BlockSpec((None, hidden, E), lm3),             # w2 (pre-T)
        pl.BlockSpec((None, 1, E), lm3),                  # b2
    ]
    args = (x,
            w["ln1_w"], w["ln1_b"],
            w["in_w"], w["in_b"],
            w["wo"], w["out_b"],
            w["ln2_w"], w["ln2_b"],
            w["w1"], w["b1"], w["w2"], w["b2"])

    return pl.pallas_call(
        partial(fused_layers_kernel, heads=heads),
        out_shape=jax.ShapeDtypeStruct((N, E), x.dtype),
        grid_spec=pltpu.PrefetchScalarGridSpec(
            num_scalar_prefetch=0,
            grid=(L,),
            in_specs=in_specs,
            out_specs=pl.BlockSpec((N, E), lambda l: (0, 0)),
            scratch_shapes=[pltpu.VMEM((N, E), jnp.float32)],
        ),
        compiler_params=pltpu.CompilerParams(
            dimension_semantics=("arbitrary",),
            vmem_limit_bytes=32 * 1024 * 1024,
        ),
    )(*args)


# ---------------- pure-JAX reference (silent sanity check) ----------------
def _ref_layer(x, p, heads):
    E = x.shape[-1]
    D = E // heads
    eps = 1e-5

    def ln(v, w, b):
        mu = jnp.mean(v, -1, keepdims=True)
        var = jnp.mean((v - mu) ** 2, -1, keepdims=True)
        return (v - mu) / jnp.sqrt(var + eps) * w + b

    xn = ln(x, p["ln1_w"], p["ln1_b"])
    qkv = xn @ p["in_w"].T + p["in_b"]
    q, k, v = qkv[:, :E], qkv[:, E:2 * E], qkv[:, 2 * E:]
    outs = []
    for h in range(heads):
        qh = q[:, h * D:(h + 1) * D] / jnp.sqrt(float(D))
        kh = k[:, h * D:(h + 1) * D]
        vh = v[:, h * D:(h + 1) * D]
        s = qh @ kh.T
        p_ = jax.nn.softmax(s, axis=-1)
        outs.append(p_ @ vh)
    attn = jnp.concatenate(outs, -1) @ p["out_w"].T + p["out_b"]
    x = x + attn
    xn2 = ln(x, p["ln2_w"], p["ln2_b"])
    ff = jnp.maximum(xn2 @ p["lin1_w"].T + p["lin1_b"], 0.0) @ p["lin2_w"].T + p["lin2_b"]
    return x + ff


def _ref(x, params, heads):
    for p in params:
        x = _ref_layer(x, p, heads)
    return x


# ---------------- deterministic parameter construction ----------------
def make_params(key, num_layers, E, hidden):
    params = []
    for _ in range(num_layers):
        key, *ks = jax.random.split(key, 7)
        p = {
            "ln1_w": jnp.ones((1, E), jnp.float32),
            "ln1_b": jnp.zeros((1, E), jnp.float32),
            "in_w": 0.05 * jax.random.normal(ks[0], (3 * E, E), jnp.float32),
            "in_b": 0.01 * jax.random.normal(ks[1], (1, 3 * E), jnp.float32),
            "out_w": 0.05 * jax.random.normal(ks[2], (E, E), jnp.float32),
            "out_b": 0.01 * jax.random.normal(ks[3], (1, E), jnp.float32),
            "ln2_w": jnp.ones((1, E), jnp.float32),
            "ln2_b": jnp.zeros((1, E), jnp.float32),
            "lin1_w": 0.05 * jax.random.normal(ks[4], (hidden, E), jnp.float32),
            "lin1_b": jnp.zeros((1, hidden), jnp.float32),
            "lin2_w": 0.05 * jax.random.normal(ks[5], (E, hidden), jnp.float32),
            "lin2_b": jnp.zeros((1, E), jnp.float32),
        }
        params.append(p)
    return params


if __name__ == "__main__":
    # TransformerInteractor(input_size=32, hidden_size=64, num_layers=2,
    #                       heads=4, dropout=0.0, use_gpu=False)
    N_OBJECT = 8
    INPUT_SIZE = 32
    HIDDEN = 64
    HEADS = 4
    NUM_LAYERS = 2

    key = jax.random.PRNGKey(0)
    kx, kp = jax.random.split(key)
    x = jax.random.normal(kx, (N_OBJECT, INPUT_SIZE), jnp.float32)
    params = make_params(kp, NUM_LAYERS, INPUT_SIZE, HIDDEN)

    fwd = jax.jit(partial(transformer_interactor, heads=HEADS))
    out = jax.block_until_ready(fwd(x, params))

    # silent sanity check against pure-JAX reference
    ref = jax.block_until_ready(_ref(x, params, HEADS))
    assert out.shape == (N_OBJECT, INPUT_SIZE)
    assert bool(jnp.allclose(out, ref, rtol=1e-2, atol=1e-2))

    print("KERNEL_OK")
</pallas_src>

<mosaic_0001>
module attributes {stable_mosaic.version = 11 : i64} {
  func.func @fused_layers_kernel(%arg0: i32, %arg1: memref<8x32xf32, #tpu.memory_space<vmem>>, %arg2: memref<1x1x32xf32, #tpu.memory_space<vmem>>, %arg3: memref<1x1x32xf32, #tpu.memory_space<vmem>>, %arg4: memref<1x12x32x8xf32, #tpu.memory_space<vmem>>, %arg5: memref<1x12x1x8xf32, #tpu.memory_space<vmem>>, %arg6: memref<1x4x8x32xf32, #tpu.memory_space<vmem>>, %arg7: memref<1x1x32xf32, #tpu.memory_space<vmem>>, %arg8: memref<1x1x32xf32, #tpu.memory_space<vmem>>, %arg9: memref<1x1x32xf32, #tpu.memory_space<vmem>>, %arg10: memref<1x32x64xf32, #tpu.memory_space<vmem>>, %arg11: memref<1x1x64xf32, #tpu.memory_space<vmem>>, %arg12: memref<1x64x32xf32, #tpu.memory_space<vmem>>, %arg13: memref<1x1x32xf32, #tpu.memory_space<vmem>>, %arg14: memref<8x32xf32, #tpu.memory_space<vmem>>, %arg15: memref<8x32xf32, #tpu.memory_space<vmem>>) attributes {dimension_semantics = [#tpu.dimension_semantics<arbitrary>], iteration_bounds = array<i64: 2>, scalar_prefetch = 0 : i64, scratch_operands = 1 : i64, tpu.core_type = #tpu.core_type<tc>, window_params = [{pipeline_mode = #tpu.pipeline_mode<synchronous>, transform_indices = @transform_0, window_bounds = array<i64: 8, 32>}, {transform_indices = @transform_1, window_bounds = array<i64: 1, 1, 32>}, {transform_indices = @transform_2, window_bounds = array<i64: 1, 1, 32>}, {transform_indices = @transform_3, window_bounds = array<i64: 1, 12, 32, 8>}, {transform_indices = @transform_4, window_bounds = array<i64: 1, 12, 1, 8>}, {transform_indices = @transform_5, window_bounds = array<i64: 1, 4, 8, 32>}, {transform_indices = @transform_6, window_bounds = array<i64: 1, 1, 32>}, {transform_indices = @transform_7, window_bounds = array<i64: 1, 1, 32>}, {transform_indices = @transform_8, window_bounds = array<i64: 1, 1, 32>}, {transform_indices = @transform_9, window_bounds = array<i64: 1, 32, 64>}, {transform_indices = @transform_10, window_bounds = array<i64: 1, 1, 64>}, {transform_indices = @transform_11, window_bounds = array<i64: 1, 64, 32>}, {transform_indices = @transform_12, window_bounds = array<i64: 1, 1, 32>}, {pipeline_mode = #tpu.pipeline_mode<synchronous>, transform_indices = @transform_13, window_bounds = array<i64: 8, 32>}]} {
    %c0_i32 = arith.constant 0 : i32
    %0 = arith.cmpi eq, %arg0, %c0_i32 : i32
    %1 = arith.extui %0 : i1 to i32
    %c0_i32_0 = arith.constant 0 : i32
    %2 = arith.cmpi ne, %1, %c0_i32_0 : i32
    scf.if %2 {
      %c0_177 = arith.constant 0 : index
      %c0_178 = arith.constant 0 : index
      %229 = vector.load %arg1[%c0_177, %c0_178] : memref<8x32xf32, #tpu.memory_space<vmem>>, vector<8x32xf32>
      %c0_179 = arith.constant 0 : index
      %c0_180 = arith.constant 0 : index
      %230 = vector.load %arg15[%c0_179, %c0_180] : memref<8x32xf32, #tpu.memory_space<vmem>>, vector<8x32xf32>
      tpu.vector_store %arg15[%c0_179, %c0_180], %229 {strides = array<i32>} : memref<8x32xf32, #tpu.memory_space<vmem>>, vector<8x32xf32>,
    } else {
    }
    %c0 = arith.constant 0 : index
    %c0_1 = arith.constant 0 : index
    %3 = vector.load %arg15[%c0, %c0_1] : memref<8x32xf32, #tpu.memory_space<vmem>>, vector<8x32xf32>
    %c0_2 = arith.constant 0 : index
    %c0_3 = arith.constant 0 : index
    %c0_4 = arith.constant 0 : index
    %4 = vector.load %arg2[%c0_2, %c0_3, %c0_4] : memref<1x1x32xf32, #tpu.memory_space<vmem>>, vector<1x1x32xf32>
    %5 = vector.shape_cast %4 : vector<1x1x32xf32> to vector<1x32xf32>
    %c0_5 = arith.constant 0 : index
    %c0_6 = arith.constant 0 : index
    %c0_7 = arith.constant 0 : index
    %6 = vector.load %arg3[%c0_5, %c0_6, %c0_7] : memref<1x1x32xf32, #tpu.memory_space<vmem>>, vector<1x1x32xf32>
    %7 = vector.shape_cast %6 : vector<1x1x32xf32> to vector<1x32xf32>
    %cst = arith.constant dense<0.000000e+00> : vector<8xf32>
    %8 = vector.multi_reduction <add>, %3, %cst [1] : vector<8x32xf32> to vector<8xf32>
    %9 = vector.shape_cast %8 : vector<8xf32> to vector<8x1xf32>
    %cst_8 = arith.constant 3.200000e+01 : f32
    %10 = vector.broadcast %cst_8 : f32 to vector<8x1xf32>
    %11 = arith.divf %9, %10 : vector<8x1xf32>
    %12 = vector.broadcast %11 : vector<8x1xf32> to vector<8x32xf32>
    %13 = arith.subf %3, %12 : vector<8x32xf32>
    %14 = arith.mulf %13, %13 : vector<8x32xf32>
    %cst_9 = arith.constant dense<0.000000e+00> : vector<8xf32>
    %15 = vector.multi_reduction <add>, %14, %cst_9 [1] : vector<8x32xf32> to vector<8xf32>
    %16 = vector.shape_cast %15 : vector<8xf32> to vector<8x1xf32>
    %cst_10 = arith.constant 3.200000e+01 : f32
    %17 = vector.broadcast %cst_10 : f32 to vector<8x1xf32>
    %18 = arith.divf %16, %17 : vector<8x1xf32>
    %19 = vector.broadcast %11 : vector<8x1xf32> to vector<8x32xf32>
    %20 = arith.subf %3, %19 : vector<8x32xf32>
    %cst_11 = arith.constant 9.99999974E-6 : f32
    %21 = vector.broadcast %cst_11 : f32 to vector<8x1xf32>
    %22 = arith.addf %18, %21 : vector<8x1xf32>
    %23 = math.rsqrt %22 : vector<8x1xf32>
    %24 = vector.broadcast %23 : vector<8x1xf32> to vector<8x32xf32>
    %25 = arith.mulf %20, %24 : vector<8x32xf32>
    %26 = vector.broadcast %5 : vector<1x32xf32> to vector<8x32xf32>
    %27 = arith.mulf %25, %26 : vector<8x32xf32>
    %28 = vector.broadcast %7 : vector<1x32xf32> to vector<8x32xf32>
    %29 = arith.addf %27, %28 : vector<8x32xf32>
    %c0_12 = arith.constant 0 : index
    %c0_13 = arith.constant 0 : index
    %c0_14 = arith.constant 0 : index
    %c0_15 = arith.constant 0 : index
    %30 = vector.load %arg4[%c0_12, %c0_13, %c0_14, %c0_15] : memref<1x12x32x8xf32, #tpu.memory_space<vmem>>, vector<1x1x32x8xf32>
    %31 = vector.shape_cast %30 : vector<1x1x32x8xf32> to vector<32x8xf32>
    %cst_16 = arith.constant dense<0.000000e+00> : vector<8x8xf32>
    %32 = tpu.matmul %29, %31, %cst_16 {dimension_numbers = #tpu.dot_dimension_numbers<[1], [0], [0], [1], [0, 0, 1, 1], [], []>} : vector<8x32xf32>, vector<32x8xf32>, vector<8x8xf32> -> vector<8x8xf32>
    %c0_17 = arith.constant 0 : index
    %c0_18 = arith.constant 0 : index
    %c0_19 = arith.constant 0 : index
    %c0_20 = arith.constant 0 : index
    %33 = vector.load %arg5[%c0_17, %c0_18, %c0_19, %c0_20] : memref<1x12x1x8xf32, #tpu.memory_space<vmem>>, vector<1x1x1x8xf32>
    %34 = vector.shape_cast %33 : vector<1x1x1x8xf32> to vector<1x8xf32>
    %35 = vector.broadcast %34 : vector<1x8xf32> to vector<8x8xf32>
    %36 = arith.addf %32, %35 : vector<8x8xf32>
    %c0_21 = arith.constant 0 : index
    %c4 = arith.constant 4 : index
    %c0_22 = arith.constant 0 : index
    %c0_23 = arith.constant 0 : index
    %37 = vector.load %arg4[%c0_21, %c4, %c0_22, %c0_23] : memref<1x12x32x8xf32, #tpu.memory_space<vmem>>, vector<1x1x32x8xf32>
    %38 = vector.shape_cast %37 : vector<1x1x32x8xf32> to vector<32x8xf32>
    %cst_24 = arith.constant dense<0.000000e+00> : vector<8x8xf32>
    %39 = tpu.matmul %29, %38, %cst_24 {dimension_numbers = #tpu.dot_dimension_numbers<[1], [0], [0], [1], [0, 0, 1, 1], [], []>} : vector<8x32xf32>, vector<32x8xf32>, vector<8x8xf32> -> vector<8x8xf32>
    %c0_25 = arith.constant 0 : index
    %c4_26 = arith.constant 4 : index
    %c0_27 = arith.constant 0 : index
    %c0_28 = arith.constant 0 : index
    %40 = vector.load %arg5[%c0_25, %c4_26, %c0_27, %c0_28] : memref<1x12x1x8xf32, #tpu.memory_space<vmem>>, vector<1x1x1x8xf32>
    %41 = vector.shape_cast %40 : vector<1x1x1x8xf32> to vector<1x8xf32>
    %42 = vector.broadcast %41 : vector<1x8xf32> to vector<8x8xf32>
    %43 = arith.addf %39, %42 : vector<8x8xf32>
    %c0_29 = arith.constant 0 : index
    %c8 = arith.constant 8 : index
    %c0_30 = arith.constant 0 : index
    %c0_31 = arith.constant 0 : index
    %44 = vector.load %arg4[%c0_29, %c8, %c0_30, %c0_31] : memref<1x12x32x8xf32, #tpu.memory_space<vmem>>, vector<1x1x32x8xf32>
    %45 = vector.shape_cast %44 : vector<1x1x32x8xf32> to vector<32x8xf32>
    %cst_32 = arith.constant dense<0.000000e+00> : vector<8x8xf32>
    %46 = tpu.matmul %29, %45, %cst_32 {dimension_numbers = #tpu.dot_dimension_numbers<[1], [0], [0], [1], [0, 0, 1, 1], [], []>} : vector<8x32xf32>, vector<32x8xf32>, vector<8x8xf32> -> vector<8x8xf32>
    %c0_33 = arith.constant 0 : index
    %c8_34 = arith.constant 8 : index
    %c0_35 = arith.constant 0 : index
    %c0_36 = arith.constant 0 : index
    %47 = vector.load %arg5[%c0_33, %c8_34, %c0_35, %c0_36] : memref<1x12x1x8xf32, #tpu.memory_space<vmem>>, vector<1x1x1x8xf32>
    %48 = vector.shape_cast %47 : vector<1x1x1x8xf32> to vector<1x8xf32>
    %49 = vector.broadcast %48 : vector<1x8xf32> to vector<8x8xf32>
    %50 = arith.addf %46, %49 : vector<8x8xf32>
    %cst_37 = arith.constant dense<0.000000e+00> : vector<8x8xf32>
    %51 = tpu.matmul %36, %43, %cst_37 {dimension_numbers = #tpu.dot_dimension_numbers<[1], [1], [0], [0], [0, 0, 1, 0], [], []>} : vector<8x8xf32>, vector<8x8xf32>, vector<8x8xf32> -> vector<8x8xf32>
    %cst_38 = arith.constant dense<0xFF800000> : vector<8xf32>
    %52 = vector.multi_reduction <maximumf>, %51, %cst_38 [1] : vector<8x8xf32> to vector<8xf32>
    %53 = vector.shape_cast %52 : vector<8xf32> to vector<8x1xf32>
    %54 = vector.broadcast %53 : vector<8x1xf32> to vector<8x8xf32>
    %55 = arith.subf %51, %54 : vector<8x8xf32>
    %56 = math.exp %55 : vector<8x8xf32>
    %cst_39 = arith.constant dense<0.000000e+00> : vector<8xf32>
    %57 = vector.multi_reduction <add>, %56, %cst_39 [1] : vector<8x8xf32> to vector<8xf32>
    %58 = vector.shape_cast %57 : vector<8xf32> to vector<8x1xf32>
    %59 = tpu.reciprocal %58 {approx = true} : vector<8x1xf32> -> vector<8x1xf32>
    %60 = vector.broadcast %59 : vector<8x1xf32> to vector<8x8xf32>
    %61 = arith.mulf %56, %60 : vector<8x8xf32>
    %cst_40 = arith.constant dense<0.000000e+00> : vector<8x8xf32>
    %62 = tpu.matmul %61, %50, %cst_40 {dimension_numbers = #tpu.dot_dimension_numbers<[1], [0], [0], [1], [0, 0, 1, 1], [], []>} : vector<8x8xf32>, vector<8x8xf32>, vector<8x8xf32> -> vector<8x8xf32>
    %c0_41 = arith.constant 0 : index
    %c0_42 = arith.constant 0 : index
    %c0_43 = arith.constant 0 : index
    %c0_44 = arith.constant 0 : index
    %63 = vector.load %arg6[%c0_41, %c0_42, %c0_43, %c0_44] : memref<1x4x8x32xf32, #tpu.memory_space<vmem>>, vector<1x1x8x32xf32>
    %64 = vector.shape_cast %63 : vector<1x1x8x32xf32> to vector<8x32xf32>
    %cst_45 = arith.constant dense<0.000000e+00> : vector<8x32xf32>
    %65 = tpu.matmul %62, %64, %cst_45 {dimension_numbers = #tpu.dot_dimension_numbers<[1], [0], [0], [1], [0, 0, 1, 1], [], []>} : vector<8x8xf32>, vector<8x32xf32>, vector<8x32xf32> -> vector<8x32xf32>
    %c0_46 = arith.constant 0 : index
    %c1 = arith.constant 1 : index
    %c0_47 = arith.constant 0 : index
    %c0_48 = arith.constant 0 : index
    %66 = vector.load %arg4[%c0_46, %c1, %c0_47, %c0_48] : memref<1x12x32x8xf32, #tpu.memory_space<vmem>>, vector<1x1x32x8xf32>
    %67 = vector.shape_cast %66 : vector<1x1x32x8xf32> to vector<32x8xf32>
    %cst_49 = arith.constant dense<0.000000e+00> : vector<8x8xf32>
    %68 = tpu.matmul %29, %67, %cst_49 {dimension_numbers = #tpu.dot_dimension_numbers<[1], [0], [0], [1], [0, 0, 1, 1], [], []>} : vector<8x32xf32>, vector<32x8xf32>, vector<8x8xf32> -> vector<8x8xf32>
    %c0_50 = arith.constant 0 : index
    %c1_51 = arith.constant 1 : index
    %c0_52 = arith.constant 0 : index
    %c0_53 = arith.constant 0 : index
    %69 = vector.load %arg5[%c0_50, %c1_51, %c0_52, %c0_53] : memref<1x12x1x8xf32, #tpu.memory_space<vmem>>, vector<1x1x1x8xf32>
    %70 = vector.shape_cast %69 : vector<1x1x1x8xf32> to vector<1x8xf32>
    %71 = vector.broadcast %70 : vector<1x8xf32> to vector<8x8xf32>
    %72 = arith.addf %68, %71 : vector<8x8xf32>
    %c0_54 = arith.constant 0 : index
    %c5 = arith.constant 5 : index
    %c0_55 = arith.constant 0 : index
    %c0_56 = arith.constant 0 : index
    %73 = vector.load %arg4[%c0_54, %c5, %c0_55, %c0_56] : memref<1x12x32x8xf32, #tpu.memory_space<vmem>>, vector<1x1x32x8xf32>
    %74 = vector.shape_cast %73 : vector<1x1x32x8xf32> to vector<32x8xf32>
    %cst_57 = arith.constant dense<0.000000e+00> : vector<8x8xf32>
    %75 = tpu.matmul %29, %74, %cst_57 {dimension_numbers = #tpu.dot_dimension_numbers<[1], [0], [0], [1], [0, 0, 1, 1], [], []>} : vector<8x32xf32>, vector<32x8xf32>, vector<8x8xf32> -> vector<8x8xf32>
    %c0_58 = arith.constant 0 : index
    %c5_59 = arith.constant 5 : index
    %c0_60 = arith.constant 0 : index
    %c0_61 = arith.constant 0 : index
    %76 = vector.load %arg5[%c0_58, %c5_59, %c0_60, %c0_61] : memref<1x12x1x8xf32, #tpu.memory_space<vmem>>, vector<1x1x1x8xf32>
    %77 = vector.shape_cast %76 : vector<1x1x1x8xf32> to vector<1x8xf32>
    %78 = vector.broadcast %77 : vector<1x8xf32> to vector<8x8xf32>
    %79 = arith.addf %75, %78 : vector<8x8xf32>
    %c0_62 = arith.constant 0 : index
    %c9 = arith.constant 9 : index
    %c0_63 = arith.constant 0 : index
    %c0_64 = arith.constant 0 : index
    %80 = vector.load %arg4[%c0_62, %c9, %c0_63, %c0_64] : memref<1x12x32x8xf32, #tpu.memory_space<vmem>>, vector<1x1x32x8xf32>
    %81 = vector.shape_cast %80 : vector<1x1x32x8xf32> to vector<32x8xf32>
    %cst_65 = arith.constant dense<0.000000e+00> : vector<8x8xf32>
    %82 = tpu.matmul %29, %81, %cst_65 {dimension_numbers = #tpu.dot_dimension_numbers<[1], [0], [0], [1], [0, 0, 1, 1], [], []>} : vector<8x32xf32>, vector<32x8xf32>, vector<8x8xf32> -> vector<8x8xf32>
    %c0_66 = arith.constant 0 : index
    %c9_67 = arith.constant 9 : index
    %c0_68 = arith.constant 0 : index
    %c0_69 = arith.constant 0 : index
    %83 = vector.load %arg5[%c0_66, %c9_67, %c0_68, %c0_69] : memref<1x12x1x8xf32, #tpu.memory_space<vmem>>, vector<1x1x1x8xf32>
    %84 = vector.shape_cast %83 : vector<1x1x1x8xf32> to vector<1x8xf32>
    %85 = vector.broadcast %84 : vector<1x8xf32> to vector<8x8xf32>
    %86 = arith.addf %82, %85 : vector<8x8xf32>
    %cst_70 = arith.constant dense<0.000000e+00> : vector<8x8xf32>
    %87 = tpu.matmul %72, %79, %cst_70 {dimension_numbers = #tpu.dot_dimension_numbers<[1], [1], [0], [0], [0, 0, 1, 0], [], []>} : vector<8x8xf32>, vector<8x8xf32>, vector<8x8xf32> -> vector<8x8xf32>
    %cst_71 = arith.constant dense<0xFF800000> : vector<8xf32>
    %88 = vector.multi_reduction <maximumf>, %87, %cst_71 [1] : vector<8x8xf32> to vector<8xf32>
    %89 = vector.shape_cast %88 : vector<8xf32> to vector<8x1xf32>
    %90 = vector.broadcast %89 : vector<8x1xf32> to vector<8x8xf32>
    %91 = arith.subf %87, %90 : vector<8x8xf32>
    %92 = math.exp %91 : vector<8x8xf32>
    %cst_72 = arith.constant dense<0.000000e+00> : vector<8xf32>
    %93 = vector.multi_reduction <add>, %92, %cst_72 [1] : vector<8x8xf32> to vector<8xf32>
    %94 = vector.shape_cast %93 : vector<8xf32> to vector<8x1xf32>
    %95 = tpu.reciprocal %94 {approx = true} : vector<8x1xf32> -> vector<8x1xf32>
    %96 = vector.broadcast %95 : vector<8x1xf32> to vector<8x8xf32>
    %97 = arith.mulf %92, %96 : vector<8x8xf32>
    %cst_73 = arith.constant dense<0.000000e+00> : vector<8x8xf32>
    %98 = tpu.matmul %97, %86, %cst_73 {dimension_numbers = #tpu.dot_dimension_numbers<[1], [0], [0], [1], [0, 0, 1, 1], [], []>} : vector<8x8xf32>, vector<8x8xf32>, vector<8x8xf32> -> vector<8x8xf32>
    %c0_74 = arith.constant 0 : index
    %c1_75 = arith.constant 1 : index
    %c0_76 = arith.constant 0 : index
    %c0_77 = arith.constant 0 : index
    %99 = vector.load %arg6[%c0_74, %c1_75, %c0_76, %c0_77] : memref<1x4x8x32xf32, #tpu.memory_space<vmem>>, vector<1x1x8x32xf32>
    %100 = vector.shape_cast %99 : vector<1x1x8x32xf32> to vector<8x32xf32>
    %cst_78 = arith.constant dense<0.000000e+00> : vector<8x32xf32>
    %101 = tpu.matmul %98, %100, %cst_78 {dimension_numbers = #tpu.dot_dimension_numbers<[1], [0], [0], [1], [0, 0, 1, 1], [], []>} : vector<8x8xf32>, vector<8x32xf32>, vector<8x32xf32> -> vector<8x32xf32>
    %102 = arith.addf %65, %101 : vector<8x32xf32>
    %c0_79 = arith.constant 0 : index
    %c2 = arith.constant 2 : index
    %c0_80 = arith.constant 0 : index
    %c0_81 = arith.constant 0 : index
    %103 = vector.load %arg4[%c0_79, %c2, %c0_80, %c0_81] : memref<1x12x32x8xf32, #tpu.memory_space<vmem>>, vector<1x1x32x8xf32>
    %104 = vector.shape_cast %103 : vector<1x1x32x8xf32> to vector<32x8xf32>
    %cst_82 = arith.constant dense<0.000000e+00> : vector<8x8xf32>
    %105 = tpu.matmul %29, %104, %cst_82 {dimension_numbers = #tpu.dot_dimension_numbers<[1], [0], [0], [1], [0, 0, 1, 1], [], []>} : vector<8x32xf32>, vector<32x8xf32>, vector<8x8xf32> -> vector<8x8xf32>
    %c0_83 = arith.constant 0 : index
    %c2_84 = arith.constant 2 : index
    %c0_85 = arith.constant 0 : index
    %c0_86 = arith.constant 0 : index
    %106 = vector.load %arg5[%c0_83, %c2_84, %c0_85, %c0_86] : memref<1x12x1x8xf32, #tpu.memory_space<vmem>>, vector<1x1x1x8xf32>
    %107 = vector.shape_cast %106 : vector<1x1x1x8xf32> to vector<1x8xf32>
    %108 = vector.broadcast %107 : vector<1x8xf32> to vector<8x8xf32>
    %109 = arith.addf %105, %108 : vector<8x8xf32>
    %c0_87 = arith.constant 0 : index
    %c6 = arith.constant 6 : index
    %c0_88 = arith.constant 0 : index
    %c0_89 = arith.constant 0 : index
    %110 = vector.load %arg4[%c0_87, %c6, %c0_88, %c0_89] : memref<1x12x32x8xf32, #tpu.memory_space<vmem>>, vector<1x1x32x8xf32>
    %111 = vector.shape_cast %110 : vector<1x1x32x8xf32> to vector<32x8xf32>
    %cst_90 = arith.constant dense<0.000000e+00> : vector<8x8xf32>
    %112 = tpu.matmul %29, %111, %cst_90 {dimension_numbers = #tpu.dot_dimension_numbers<[1], [0], [0], [1], [0, 0, 1, 1], [], []>} : vector<8x32xf32>, vector<32x8xf32>, vector<8x8xf32> -> vector<8x8xf32>
    %c0_91 = arith.constant 0 : index
    %c6_92 = arith.constant 6 : index
    %c0_93 = arith.constant 0 : index
    %c0_94 = arith.constant 0 : index
    %113 = vector.load %arg5[%c0_91, %c6_92, %c0_93, %c0_94] : memref<1x12x1x8xf32, #tpu.memory_space<vmem>>, vector<1x1x1x8xf32>
    %114 = vector.shape_cast %113 : vector<1x1x1x8xf32> to vector<1x8xf32>
    %115 = vector.broadcast %114 : vector<1x8xf32> to vector<8x8xf32>
    %116 = arith.addf %112, %115 : vector<8x8xf32>
    %c0_95 = arith.constant 0 : index
    %c10 = arith.constant 10 : index
    %c0_96 = arith.constant 0 : index
    %c0_97 = arith.constant 0 : index
    %117 = vector.load %arg4[%c0_95, %c10, %c0_96, %c0_97] : memref<1x12x32x8xf32, #tpu.memory_space<vmem>>, vector<1x1x32x8xf32>
    %118 = vector.shape_cast %117 : vector<1x1x32x8xf32> to vector<32x8xf32>
    %cst_98 = arith.constant dense<0.000000e+00> : vector<8x8xf32>
    %119 = tpu.matmul %29, %118, %cst_98 {dimension_numbers = #tpu.dot_dimension_numbers<[1], [0], [0], [1], [0, 0, 1, 1], [], []>} : vector<8x32xf32>, vector<32x8xf32>, vector<8x8xf32> -> vector<8x8xf32>
    %c0_99 = arith.constant 0 : index
    %c10_100 = arith.constant 10 : index
    %c0_101 = arith.constant 0 : index
    %c0_102 = arith.constant 0 : index
    %120 = vector.load %arg5[%c0_99, %c10_100, %c0_101, %c0_102] : memref<1x12x1x8xf32, #tpu.memory_space<vmem>>, vector<1x1x1x8xf32>
    %121 = vector.shape_cast %120 : vector<1x1x1x8xf32> to vector<1x8xf32>
    %122 = vector.broadcast %121 : vector<1x8xf32> to vector<8x8xf32>
    %123 = arith.addf %119, %122 : vector<8x8xf32>
    %cst_103 = arith.constant dense<0.000000e+00> : vector<8x8xf32>
    %124 = tpu.matmul %109, %116, %cst_103 {dimension_numbers = #tpu.dot_dimension_numbers<[1], [1], [0], [0], [0, 0, 1, 0], [], []>} : vector<8x8xf32>, vector<8x8xf32>, vector<8x8xf32> -> vector<8x8xf32>
    %cst_104 = arith.constant dense<0xFF800000> : vector<8xf32>
    %125 = vector.multi_reduction <maximumf>, %124, %cst_104 [1] : vector<8x8xf32> to vector<8xf32>
    %126 = vector.shape_cast %125 : vector<8xf32> to vector<8x1xf32>
    %127 = vector.broadcast %126 : vector<8x1xf32> to vector<8x8xf32>
    %128 = arith.subf %124, %127 : vector<8x8xf32>
    %129 = math.exp %128 : vector<8x8xf32>
    %cst_105 = arith.constant dense<0.000000e+00> : vector<8xf32>
    %130 = vector.multi_reduction <add>, %129, %cst_105 [1] : vector<8x8xf32> to vector<8xf32>
    %131 = vector.shape_cast %130 : vector<8xf32> to vector<8x1xf32>
    %132 = tpu.reciprocal %131 {approx = true} : vector<8x1xf32> -> vector<8x1xf32>
    %133 = vector.broadcast %132 : vector<8x1xf32> to vector<8x8xf32>
    %134 = arith.mulf %129, %133 : vector<8x8xf32>
    %cst_106 = arith.constant dense<0.000000e+00> : vector<8x8xf32>
    %135 = tpu.matmul %134, %123, %cst_106 {dimension_numbers = #tpu.dot_dimension_numbers<[1], [0], [0], [1], [0, 0, 1, 1], [], []>} : vector<8x8xf32>, vector<8x8xf32>, vector<8x8xf32> -> vector<8x8xf32>
    %c0_107 = arith.constant 0 : index
    %c2_108 = arith.constant 2 : index
    %c0_109 = arith.constant 0 : index
    %c0_110 = arith.constant 0 : index
    %136 = vector.load %arg6[%c0_107, %c2_108, %c0_109, %c0_110] : memref<1x4x8x32xf32, #tpu.memory_space<vmem>>, vector<1x1x8x32xf32>
    %137 = vector.shape_cast %136 : vector<1x1x8x32xf32> to vector<8x32xf32>
    %cst_111 = arith.constant dense<0.000000e+00> : vector<8x32xf32>
    %138 = tpu.matmul %135, %137, %cst_111 {dimension_numbers = #tpu.dot_dimension_numbers<[1], [0], [0], [1], [0, 0, 1, 1], [], []>} : vector<8x8xf32>, vector<8x32xf32>, vector<8x32xf32> -> vector<8x32xf32>
    %139 = arith.addf %102, %138 : vector<8x32xf32>
    %c0_112 = arith.constant 0 : index
    %c3 = arith.constant 3 : index
    %c0_113 = arith.constant 0 : index
    %c0_114 = arith.constant 0 : index
    %140 = vector.load %arg4[%c0_112, %c3, %c0_113, %c0_114] : memref<1x12x32x8xf32, #tpu.memory_space<vmem>>, vector<1x1x32x8xf32>
    %141 = vector.shape_cast %140 : vector<1x1x32x8xf32> to vector<32x8xf32>
    %cst_115 = arith.constant dense<0.000000e+00> : vector<8x8xf32>
    %142 = tpu.matmul %29, %141, %cst_115 {dimension_numbers = #tpu.dot_dimension_numbers<[1], [0], [0], [1], [0, 0, 1, 1], [], []>} : vector<8x32xf32>, vector<32x8xf32>, vector<8x8xf32> -> vector<8x8xf32>
    %c0_116 = arith.constant 0 : index
    %c3_117 = arith.constant 3 : index
    %c0_118 = arith.constant 0 : index
    %c0_119 = arith.constant 0 : index
    %143 = vector.load %arg5[%c0_116, %c3_117, %c0_118, %c0_119] : memref<1x12x1x8xf32, #tpu.memory_space<vmem>>, vector<1x1x1x8xf32>
    %144 = vector.shape_cast %143 : vector<1x1x1x8xf32> to vector<1x8xf32>
    %145 = vector.broadcast %144 : vector<1x8xf32> to vector<8x8xf32>
    %146 = arith.addf %142, %145 : vector<8x8xf32>
    %c0_120 = arith.constant 0 : index
    %c7 = arith.constant 7 : index
    %c0_121 = arith.constant 0 : index
    %c0_122 = arith.constant 0 : index
    %147 = vector.load %arg4[%c0_120, %c7, %c0_121, %c0_122] : memref<1x12x32x8xf32, #tpu.memory_space<vmem>>, vector<1x1x32x8xf32>
    %148 = vector.shape_cast %147 : vector<1x1x32x8xf32> to vector<32x8xf32>
    %cst_123 = arith.constant dense<0.000000e+00> : vector<8x8xf32>
    %149 = tpu.matmul %29, %148, %cst_123 {dimension_numbers = #tpu.dot_dimension_numbers<[1], [0], [0], [1], [0, 0, 1, 1], [], []>} : vector<8x32xf32>, vector<32x8xf32>, vector<8x8xf32> -> vector<8x8xf32>
    %c0_124 = arith.constant 0 : index
    %c7_125 = arith.constant 7 : index
    %c0_126 = arith.constant 0 : index
    %c0_127 = arith.constant 0 : index
    %150 = vector.load %arg5[%c0_124, %c7_125, %c0_126, %c0_127] : memref<1x12x1x8xf32, #tpu.memory_space<vmem>>, vector<1x1x1x8xf32>
    %151 = vector.shape_cast %150 : vector<1x1x1x8xf32> to vector<1x8xf32>
    %152 = vector.broadcast %151 : vector<1x8xf32> to vector<8x8xf32>
    %153 = arith.addf %149, %152 : vector<8x8xf32>
    %c0_128 = arith.constant 0 : index
    %c11 = arith.constant 11 : index
    %c0_129 = arith.constant 0 : index
    %c0_130 = arith.constant 0 : index
    %154 = vector.load %arg4[%c0_128, %c11, %c0_129, %c0_130] : memref<1x12x32x8xf32, #tpu.memory_space<vmem>>, vector<1x1x32x8xf32>
    %155 = vector.shape_cast %154 : vector<1x1x32x8xf32> to vector<32x8xf32>
    %cst_131 = arith.constant dense<0.000000e+00> : vector<8x8xf32>
    %156 = tpu.matmul %29, %155, %cst_131 {dimension_numbers = #tpu.dot_dimension_numbers<[1], [0], [0], [1], [0, 0, 1, 1], [], []>} : vector<8x32xf32>, vector<32x8xf32>, vector<8x8xf32> -> vector<8x8xf32>
    %c0_132 = arith.constant 0 : index
    %c11_133 = arith.constant 11 : index
    %c0_134 = arith.constant 0 : index
    %c0_135 = arith.constant 0 : index
    %157 = vector.load %arg5[%c0_132, %c11_133, %c0_134, %c0_135] : memref<1x12x1x8xf32, #tpu.memory_space<vmem>>, vector<1x1x1x8xf32>
    %158 = vector.shape_cast %157 : vector<1x1x1x8xf32> to vector<1x8xf32>
    %159 = vector.broadcast %158 : vector<1x8xf32> to vector<8x8xf32>
    %160 = arith.addf %156, %159 : vector<8x8xf32>
    %cst_136 = arith.constant dense<0.000000e+00> : vector<8x8xf32>
    %161 = tpu.matmul %146, %153, %cst_136 {dimension_numbers = #tpu.dot_dimension_numbers<[1], [1], [0], [0], [0, 0, 1, 0], [], []>} : vector<8x8xf32>, vector<8x8xf32>, vector<8x8xf32> -> vector<8x8xf32>
    %cst_137 = arith.constant dense<0xFF800000> : vector<8xf32>
    %162 = vector.multi_reduction <maximumf>, %161, %cst_137 [1] : vector<8x8xf32> to vector<8xf32>
    %163 = vector.shape_cast %162 : vector<8xf32> to vector<8x1xf32>
    %164 = vector.broadcast %163 : vector<8x1xf32> to vector<8x8xf32>
    %165 = arith.subf %161, %164 : vector<8x8xf32>
    %166 = math.exp %165 : vector<8x8xf32>
    %cst_138 = arith.constant dense<0.000000e+00> : vector<8xf32>
    %167 = vector.multi_reduction <add>, %166, %cst_138 [1] : vector<8x8xf32> to vector<8xf32>
    %168 = vector.shape_cast %167 : vector<8xf32> to vector<8x1xf32>
    %169 = tpu.reciprocal %168 {approx = true} : vector<8x1xf32> -> vector<8x1xf32>
    %170 = vector.broadcast %169 : vector<8x1xf32> to vector<8x8xf32>
    %171 = arith.mulf %166, %170 : vector<8x8xf32>
    %cst_139 = arith.constant dense<0.000000e+00> : vector<8x8xf32>
    %172 = tpu.matmul %171, %160, %cst_139 {dimension_numbers = #tpu.dot_dimension_numbers<[1], [0], [0], [1], [0, 0, 1, 1], [], []>} : vector<8x8xf32>, vector<8x8xf32>, vector<8x8xf32> -> vector<8x8xf32>
    %c0_140 = arith.constant 0 : index
    %c3_141 = arith.constant 3 : index
    %c0_142 = arith.constant 0 : index
    %c0_143 = arith.constant 0 : index
    %173 = vector.load %arg6[%c0_140, %c3_141, %c0_142, %c0_143] : memref<1x4x8x32xf32, #tpu.memory_space<vmem>>, vector<1x1x8x32xf32>
    %174 = vector.shape_cast %173 : vector<1x1x8x32xf32> to vector<8x32xf32>
    %cst_144 = arith.constant dense<0.000000e+00> : vector<8x32xf32>
    %175 = tpu.matmul %172, %174, %cst_144 {dimension_numbers = #tpu.dot_dimension_numbers<[1], [0], [0], [1], [0, 0, 1, 1], [], []>} : vector<8x8xf32>, vector<8x32xf32>, vector<8x32xf32> -> vector<8x32xf32>
    %176 = arith.addf %139, %175 : vector<8x32xf32>
    %177 = arith.addf %3, %176 : vector<8x32xf32>
    %c0_145 = arith.constant 0 : index
    %c0_146 = arith.constant 0 : index
    %c0_147 = arith.constant 0 : index
    %178 = vector.load %arg7[%c0_145, %c0_146, %c0_147] : memref<1x1x32xf32, #tpu.memory_space<vmem>>, vector<1x1x32xf32>
    %179 = vector.shape_cast %178 : vector<1x1x32xf32> to vector<1x32xf32>
    %180 = vector.broadcast %179 : vector<1x32xf32> to vector<8x32xf32>
    %181 = arith.addf %177, %180 : vector<8x32xf32>
    %c0_148 = arith.constant 0 : index
    %c0_149 = arith.constant 0 : index
    %c0_150 = arith.constant 0 : index
    %182 = vector.load %arg8[%c0_148, %c0_149, %c0_150] : memref<1x1x32xf32, #tpu.memory_space<vmem>>, vector<1x1x32xf32>
    %183 = vector.shape_cast %182 : vector<1x1x32xf32> to vector<1x32xf32>
    %c0_151 = arith.constant 0 : index
    %c0_152 = arith.constant 0 : index
    %c0_153 = arith.constant 0 : index
    %184 = vector.load %arg9[%c0_151, %c0_152, %c0_153] : memref<1x1x32xf32, #tpu.memory_space<vmem>>, vector<1x1x32xf32>
    %185 = vector.shape_cast %184 : vector<1x1x32xf32> to vector<1x32xf32>
    %cst_154 = arith.constant dense<0.000000e+00> : vector<8xf32>
    %186 = vector.multi_reduction <add>, %181, %cst_154 [1] : vector<8x32xf32> to vector<8xf32>
    %187 = vector.shape_cast %186 : vector<8xf32> to vector<8x1xf32>
    %cst_155 = arith.constant 3.200000e+01 : f32
    %188 = vector.broadcast %cst_155 : f32 to vector<8x1xf32>
    %189 = arith.divf %187, %188 : vector<8x1xf32>
    %190 = vector.broadcast %189 : vector<8x1xf32> to vector<8x32xf32>
    %191 = arith.subf %181, %190 : vector<8x32xf32>
    %192 = arith.mulf %191, %191 : vector<8x32xf32>
    %cst_156 = arith.constant dense<0.000000e+00> : vector<8xf32>
    %193 = vector.multi_reduction <add>, %192, %cst_156 [1] : vector<8x32xf32> to vector<8xf32>
    %194 = vector.shape_cast %193 : vector<8xf32> to vector<8x1xf32>
    %cst_157 = arith.constant 3.200000e+01 : f32
    %195 = vector.broadcast %cst_157 : f32 to vector<8x1xf32>
    %196 = arith.divf %194, %195 : vector<8x1xf32>
    %197 = vector.broadcast %189 : vector<8x1xf32> to vector<8x32xf32>
    %198 = arith.subf %181, %197 : vector<8x32xf32>
    %cst_158 = arith.constant 9.99999974E-6 : f32
    %199 = vector.broadcast %cst_158 : f32 to vector<8x1xf32>
    %200 = arith.addf %196, %199 : vector<8x1xf32>
    %201 = math.rsqrt %200 : vector<8x1xf32>
    %202 = vector.broadcast %201 : vector<8x1xf32> to vector<8x32xf32>
    %203 = arith.mulf %198, %202 : vector<8x32xf32>
    %204 = vector.broadcast %183 : vector<1x32xf32> to vector<8x32xf32>
    %205 = arith.mulf %203, %204 : vector<8x32xf32>
    %206 = vector.broadcast %185 : vector<1x32xf32> to vector<8x32xf32>
    %207 = arith.addf %205, %206 : vector<8x32xf32>
    %c0_159 = arith.constant 0 : index
    %c0_160 = arith.constant 0 : index
    %c0_161 = arith.constant 0 : index
    %208 = vector.load %arg10[%c0_159, %c0_160, %c0_161] : memref<1x32x64xf32, #tpu.memory_space<vmem>>, vector<1x32x64xf32>
    %209 = vector.shape_cast %208 : vector<1x32x64xf32> to vector<32x64xf32>
    %cst_162 = arith.constant dense<0.000000e+00> : vector<8x64xf32>
    %210 = tpu.matmul %207, %209, %cst_162 {dimension_numbers = #tpu.dot_dimension_numbers<[1], [0], [0], [1], [0, 0, 1, 1], [], []>} : vector<8x32xf32>, vector<32x64xf32>, vector<8x64xf32> -> vector<8x64xf32>
    %c0_163 = arith.constant 0 : index
    %c0_164 = arith.constant 0 : index
    %c0_165 = arith.constant 0 : index
    %211 = vector.load %arg11[%c0_163, %c0_164, %c0_165] : memref<1x1x64xf32, #tpu.memory_space<vmem>>, vector<1x1x64xf32>
    %212 = vector.shape_cast %211 : vector<1x1x64xf32> to vector<1x64xf32>
    %213 = vector.broadcast %212 : vector<1x64xf32> to vector<8x64xf32>
    %214 = arith.addf %210, %213 : vector<8x64xf32>
    %cst_166 = arith.constant 0.000000e+00 : f32
    %215 = vector.broadcast %cst_166 : f32 to vector<8x64xf32>
    %216 = arith.maximumf %214, %215 : vector<8x64xf32>
    %c0_167 = arith.constant 0 : index
    %c0_168 = arith.constant 0 : index
    %c0_169 = arith.constant 0 : index
    %217 = vector.load %arg12[%c0_167, %c0_168, %c0_169] : memref<1x64x32xf32, #tpu.memory_space<vmem>>, vector<1x64x32xf32>
    %218 = vector.shape_cast %217 : vector<1x64x32xf32> to vector<64x32xf32>
    %cst_170 = arith.constant dense<0.000000e+00> : vector<8x32xf32>
    %219 = tpu.matmul %216, %218, %cst_170 {dimension_numbers = #tpu.dot_dimension_numbers<[1], [0], [0], [1], [0, 0, 1, 1], [], []>} : vector<8x64xf32>, vector<64x32xf32>, vector<8x32xf32> -> vector<8x32xf32>
    %c0_171 = arith.constant 0 : index
    %c0_172 = arith.constant 0 : index
    %c0_173 = arith.constant 0 : index
    %220 = vector.load %arg13[%c0_171, %c0_172, %c0_173] : memref<1x1x32xf32, #tpu.memory_space<vmem>>, vector<1x1x32xf32>
    %221 = vector.shape_cast %220 : vector<1x1x32xf32> to vector<1x32xf32>
    %222 = vector.broadcast %221 : vector<1x32xf32> to vector<8x32xf32>
    %223 = arith.addf %219, %222 : vector<8x32xf32>
    %224 = arith.addf %181, %223 : vector<8x32xf32>
    %c0_174 = arith.constant 0 : index
    %c0_175 = arith.constant 0 : index
    %225 = vector.load %arg15[%c0_174, %c0_175] : memref<8x32xf32, #tpu.memory_space<vmem>>, vector<8x32xf32>
    tpu.vector_store %arg15[%c0_174, %c0_175], %224 {strides = array<i32>} : memref<8x32xf32, #tpu.memory_space<vmem>>, vector<8x32xf32>,
    %c1_i32 = arith.constant 1 : i32
    %226 = arith.cmpi eq, %arg0, %c1_i32 : i32
    %227 = arith.extui %226 : i1 to i32
    %c0_i32_176 = arith.constant 0 : i32
    %228 = arith.cmpi ne, %227, %c0_i32_176 : i32
    scf.if %228 {
      %c0_177 = arith.constant 0 : index
      %c0_178 = arith.constant 0 : index
      %229 = vector.load %arg14[%c0_177, %c0_178] : memref<8x32xf32, #tpu.memory_space<vmem>>, vector<8x32xf32>
      tpu.vector_store %arg14[%c0_177, %c0_178], %224 {strides = array<i32>} : memref<8x32xf32, #tpu.memory_space<vmem>>, vector<8x32xf32>,
    } else {
    }
    return
  }
  func.func @transform_0(%arg0: i32) -> (i32, i32) {
    %c0_i32 = arith.constant 0 : i32
    %c0_i32_0 = arith.constant 0 : i32
    %c0_i32_1 = arith.constant 0 : i32
    return %c0_i32, %c0_i32_0 : i32, i32
  }
  func.func @transform_1(%arg0: i32) -> (i32, i32, i32) {
    %c0_i32 = arith.constant 0 : i32
    %c0_i32_0 = arith.constant 0 : i32
    %c0_i32_1 = arith.constant 0 : i32
    return %arg0, %c0_i32, %c0_i32_0 : i32, i32, i32
  }
  func.func @transform_2(%arg0: i32) -> (i32, i32, i32) {
    %c0_i32 = arith.constant 0 : i32
    %c0_i32_0 = arith.constant 0 : i32
    %c0_i32_1 = arith.constant 0 : i32
    return %arg0, %c0_i32, %c0_i32_0 : i32, i32, i32
  }
  func.func @transform_3(%arg0: i32) -> (i32, i32, i32, i32) {
    %c0_i32 = arith.constant 0 : i32
    %c0_i32_0 = arith.constant 0 : i32
    %c0_i32_1 = arith.constant 0 : i32
    %c0_i32_2 = arith.constant 0 : i32
    return %arg0, %c0_i32, %c0_i32_0, %c0_i32_1 : i32, i32, i32, i32
  }
  func.func @transform_4(%arg0: i32) -> (i32, i32, i32, i32) {
    %c0_i32 = arith.constant 0 : i32
    %c0_i32_0 = arith.constant 0 : i32
    %c0_i32_1 = arith.constant 0 : i32
    %c0_i32_2 = arith.constant 0 : i32
    return %arg0, %c0_i32, %c0_i32_0, %c0_i32_1 : i32, i32, i32, i32
  }
  func.func @transform_5(%arg0: i32) -> (i32, i32, i32, i32) {
    %c0_i32 = arith.constant 0 : i32
    %c0_i32_0 = arith.constant 0 : i32
    %c0_i32_1 = arith.constant 0 : i32
    %c0_i32_2 = arith.constant 0 : i32
    return %arg0, %c0_i32, %c0_i32_0, %c0_i32_1 : i32, i32, i32, i32
  }
  func.func @transform_6(%arg0: i32) -> (i32, i32, i32) {
    %c0_i32 = arith.constant 0 : i32
    %c0_i32_0 = arith.constant 0 : i32
    %c0_i32_1 = arith.constant 0 : i32
    return %arg0, %c0_i32, %c0_i32_0 : i32, i32, i32
  }
  func.func @transform_7(%arg0: i32) -> (i32, i32, i32) {
    %c0_i32 = arith.constant 0 : i32
    %c0_i32_0 = arith.constant 0 : i32
    %c0_i32_1 = arith.constant 0 : i32
    return %arg0, %c0_i32, %c0_i32_0 : i32, i32, i32
  }
  func.func @transform_8(%arg0: i32) -> (i32, i32, i32) {
    %c0_i32 = arith.constant 0 : i32
    %c0_i32_0 = arith.constant 0 : i32
    %c0_i32_1 = arith.constant 0 : i32
    return %arg0, %c0_i32, %c0_i32_0 : i32, i32, i32
  }
  func.func @transform_9(%arg0: i32) -> (i32, i32, i32) {
    %c0_i32 = arith.constant 0 : i32
    %c0_i32_0 = arith.constant 0 : i32
    %c0_i32_1 = arith.constant 0 : i32
    return %arg0, %c0_i32, %c0_i32_0 : i32, i32, i32
  }
  func.func @transform_10(%arg0: i32) -> (i32, i32, i32) {
    %c0_i32 = arith.constant 0 : i32
    %c0_i32_0 = arith.constant 0 : i32
    %c0_i32_1 = arith.constant 0 : i32
    return %arg0, %c0_i32, %c0_i32_0 : i32, i32, i32
  }
  func.func @transform_11(%arg0: i32) -> (i32, i32, i32) {
    %c0_i32 = arith.constant 0 : i32
    %c0_i32_0 = arith.constant 0 : i32
    %c0_i32_1 = arith.constant 0 : i32
    return %arg0, %c0_i32, %c0_i32_0 : i32, i32, i32
  }
  func.func @transform_12(%arg0: i32) -> (i32, i32, i32) {
    %c0_i32 = arith.constant 0 : i32
    %c0_i32_0 = arith.constant 0 : i32
    %c0_i32_1 = arith.constant 0 : i32
    return %arg0, %c0_i32, %c0_i32_0 : i32, i32, i32
  }
  func.func @transform_13(%arg0: i32) -> (i32, i32) {
    %c0_i32 = arith.constant 0 : i32
    %c0_i32_0 = arith.constant 0 : i32
    %c0_i32_1 = arith.constant 0 : i32
    return %c0_i32, %c0_i32_0 : i32, i32
  }
}

</mosaic_0001>

<bundles_post_ra>
// kernel: transformer_interactor.1
= control target key start
LH: loop header
LB: loop body
LE: loop exit
PB: predicated region body
PF: predicated region fallthrough
CT: control target
= control target key end

     0   :  { %s2166_s0 = inlined_call_operand.vmem [shape: f32[8,32], index: 0, kind: input, shape index: {}]   ;;  %s2167_s1 = inlined_call_operand.vmem [shape: f32[2,1,32], index: 1, kind: input, shape index: {}]   ;;  %s2168_s2 = inlined_call_operand.vmem [shape: f32[2,1,32], index: 2, kind: input, shape index: {}]   ;;  %s2169_s3 = inlined_call_operand.vmem [shape: f32[2,12,32,8], index: 3, kind: input, shape index: {}]   ;;  %s2170_s4 = inlined_call_operand.vmem [shape: f32[2,12,1,8], index: 4, kind: input, shape index: {}]   ;;  %s2171_s5 = inlined_call_operand.vmem [shape: f32[2,4,8,32], index: 5, kind: input, shape index: {}]   ;;  %s2172_s6 = inlined_call_operand.vmem [shape: f32[2,1,32], index: 6, kind: input, shape index: {}]   ;;  %s2173_s7 = inlined_call_operand.vmem [shape: f32[2,1,32], index: 7, kind: input, shape index: {}]   ;;  %s2174_s8 = inlined_call_operand.vmem [shape: f32[2,1,32], index: 8, kind: input, shape index: {}]   ;;  %s2175_s9 = inlined_call_operand.vmem [shape: f32[2,32,64], index: 9, kind: input, shape index: {}]   ;;  %s2176_s10 = inlined_call_operand.vmem [shape: f32[2,1,64], index: 10, kind: input, shape index: {}]   ;;  %s2177_s11 = inlined_call_operand.vmem [shape: f32[2,64,32], index: 11, kind: input, shape index: {}]   ;;  %s2178_s12 = inlined_call_operand.vmem [shape: f32[2,1,32], index: 12, kind: input, shape index: {}]   ;;  %s2179_s13 = inlined_call_operand.hbm [shape: f32[8,32], index: 13, kind: output, shape index: {}]  }
   0x1   :  { %2182 = sst [smem:[#allocation8_spill]] %s2168_s2 }
   0x2   :  { %2183 = sst [smem:[#allocation9_spill]] %s2169_s3 }
   0x3   :  { %2184 = sst [smem:[#allocation10_spill]] %s2171_s5 }
   0x4   :  { %2185 = sst [smem:[#allocation11_spill]] %s2179_s13 }
   0x5   :  { %18 = vsyncpa [#allocation4], 0  ;;  %s1904_s25 = smov 0  }
   0x6 LB: > { %2186 = sst [smem:[#allocation6_spill]] %s1830_s25  ;;  %s1910_s26 = sadd.s32 4294967295, %s1830_s25   ;;  %s1830_s25 = sphi %s1904_s25, %s24_s25  }
   0x7   : > { %p1628_p0 = scmp.ge.s32.totalorder %s1830_s25, 1  ;;  %p478_p1 = scmp.lt.s32.totalorder %s1830_s25, 3 }
   0x9   : > { %p479_p2 = pnand %p1628_p0, %p478_p1 }
   0xb   : > { %482 = sbr.rel (%p479_p2) target bundleno = 3084 (0xc0c), region = 72 }
  0x10   : > { %p557_p3 = scmp.lt.s32.totalorder %s1910_s26, 1  ;;  %s2188_s5 = sld [smem:[#allocation10_spill]] }
  0x11   : > { %s2190_s3 = sld [smem:[#allocation9_spill]]  ;;  %p1636_p4 = scmp.ne.s32.totalorder %s1910_s26, 0 }
  0x12   : > { %s1916_s27 = scalar_select %p557_p3, %s1910_s26, 1 }
  0x14   : > { %s1733_s17 = smul.u32 384, %s1916_s27  ;;  %s1730_s18 = sshll.u32 %s1916_s27, 5 }
  0x15   : > { %s1734_s19 = smul.u32 12, %s1916_s27  ;;  %s582_s20 = scalar_lea.vmem %s2173_s7, %s1916_s27 }
  0x16   : > { %s1932_s22 = scalar_lea.vmem %s2188_s5, %s1730_s18  ;;  %s1959_s24 = scalar_lea.vmem %s2175_s9, %s1730_s18 }
  0x17   : > { %2189 = sst [smem:[#allocation7_spill]] %s1932_s22  ;;  %s1937_s28 = scalar_lea.vmem %s2190_s3, %s1733_s17 }
  0x18   : > { %s1946_s15 = scalar_lea.vmem %s2170_s4, %s1734_s19  ;;  %s585_s22 = scalar_lea.vmem %s2174_s8, %s1916_s27 }
  0x19   : > { %s593_s30 = scalar_lea.vmem %s2176_s10, %s1916_s27  ;;  %s1732_s13 = sshll.u32 %s1916_s27, 6 }
  0x1a   : > { %s1969_s3 = scalar_lea.vmem %s2177_s11, %s1732_s13  ;;  %s601_s5 = scalar_lea.vmem %s2178_s12, %s1916_s27 }
  0x1b   : > { %605 = sbr.rel (%p1636_p4) target bundleno = 34 (0x22), region = 76 }
  0x20   : > { %v606_v0 = vld [vmem:[%s2166_s0] sm:$0xff]  ;;  %vm607_vm0 = vcmask 261120  }
  0x21   : > { %608 = vst.msk [vmem:[#allocation2] sm:$0xff] %vm607_vm0, %v606_v0 }
  0x22 PF: > { %vm612_vm1 = vcmask 261120   ;;  %v1832_v3 = vmov 32.0   ;;  %v653_v15 = vld [vmem:[%s1937_s28 + $0x18] sm:$0xff]  ;;  %v652_v18 = vld [vmem:[%s1937_s28 + $0x10] sm:$0xff]  ;;  %v651_v21 = vld [vmem:[%s1937_s28 + $0x8] sm:$0xff]  ;;  %s2191_s25 = scalar_lea.vmem %s2167_s1, %s1916_s27  ;;  %s2192_s19 = sld [smem:[#allocation8_spill]] }
  0x23   : > { %1770 = vrcp.f32 %v1832_v3  ;;  %v1647_v16 = vld [vmem:[%s1937_s28 + $0x118] sm:$0xff]  ;;  %673 = vmatpush.msra.mxu1 %v653_v15  ;;  %v1646_v19 = vld [vmem:[%s1937_s28 + $0x110] sm:$0xff]  ;;  %v1645_v22 = vld [vmem:[%s1937_s28 + $0x108] sm:$0xff]  ;;  %vm741_vm6 = vcmask 64512   ;;  %s2194_s2 = sld [smem:[#allocation7_spill]]  ;;  %s2195_s16 = scalar_lea.vmem %s2172_s6, %s1916_s27  ;;  %vm1435_vm10 = vcmask 523264  }
  0x24   : > { %v1656_v17 = vld [vmem:[%s1937_s28 + $0x38] sm:$0xff]  ;;  %733 = vmatpush.msra.mxu2 %v1647_v16  ;;  %v1655_v20 = vld [vmem:[%s1937_s28 + $0x30] sm:$0xff]  ;;  %v1654_v23 = vld [vmem:[%s1937_s28 + $0x28] sm:$0xff]  ;;  %p1725_p5 = scmp.ne.s32.totalorder %s1910_s26, 1 }
  0x25   : > { %825 = vmatpush.msra.mxu0 %v1656_v17  ;;  %674 = vmatpush.msra.mxu1 %v652_v18  ;;  %v650_v24 = vld [vmem:[%s1937_s28] sm:$0xff]  ;;  %v1641_v27 = vld [vmem:[%s1937_s28 + $0x98] sm:$0xff]  ;;  %v1640_v29 = vld [vmem:[%s1937_s28 + $0x90] sm:$0xff] }
  0x26   : > { %734 = vmatpush.msra.mxu2 %v1646_v19  ;;  %v1644_v25 = vld [vmem:[%s1937_s28 + $0x100] sm:$0xff]  ;;  %v1668_v28 = vld [vmem:[%s1937_s28 + $0x138] sm:$0xff]  ;;  %v1667_v30 = vld [vmem:[%s1937_s28 + $0x130] sm:$0xff] }
  0x27   : > { %826 = vmatpush.msra.mxu0 %v1655_v20  ;;  %675 = vmatpush.msra.mxu1 %v651_v21  ;;  %v1653_v26 = vld [vmem:[%s1937_s28 + $0x20] sm:$0xff]  ;;  %v1639_v32 = vld [vmem:[%s1937_s28 + $0x88] sm:$0xff]  ;;  %v1662_v50 = vld [vmem:[%s1937_s28 + $0xb8] sm:$0xff] }
  0x28   : > { %v1979_v1 = vld [vmem:[#allocation2] sm:$0xff]  ;;  %735 = vmatpush.msra.mxu2 %v1645_v22  ;;  %v1666_v33 = vld [vmem:[%s1937_s28 + $0x128] sm:$0xff]  ;;  %s2193_s14 = scalar_lea.vmem %s2192_s19, %s1916_s27  ;;  %v1661_v51 = vld [vmem:[%s1937_s28 + $0xb0] sm:$0xff] }
  0x29   : > { %v613_v2 = vsel %vm612_vm1, %v1979_v1, 0.0  ;;  %v1771_v4 = vpop.eup %1770  ;;  %827 = vmatpush.msra.mxu0 %v1654_v23  ;;  %676 = vmatpush.msra.mxu1 %v650_v24  ;;  %v1638_v35 = vld [vmem:[%s1937_s28 + $0x80] sm:$0xff]  ;;  %v1660_v52 = vld [vmem:[%s1937_s28 + $0xa8] sm:$0xff]  ;;  %v1680_v17 = vld [vmem:[%s1937_s28 + $0x58] sm:$0xff] }
  0x2a   : > { %614 = vadd.xlane.f32.xlu0 %v613_v2  ;;  %v617_v5 = vmul.f32 32.0, %v1771_v4  ;;  %vm621_vm2 = vweird.f32 %v1771_v4  ;;  %736 = vmatpush.msra.mxu2 %v1644_v25  ;;  %v1665_v36 = vld [vmem:[%s1937_s28 + $0x120] sm:$0xff]  ;;  %v1755_v56 = vld [vmem:[%s1946_s15 + $0x8] ss:$0 sm:$0xff]  ;;  %v1757_v62 = vld [vmem:[%s1946_s15 + $0x9] ss:$0 sm:$0xff] }
  0x2b   : > { %828 = vmatpush.msra.mxu0 %v1653_v26  ;;  %703 = vmatpush.msrb.mxu1 %v1641_v27  ;;  %v1751_v44 = vld [vmem:[%s2191_s25] ss:$0 sm:$0xff]  ;;  %v1756_v55 = vld [vmem:[%s1946_s15 + $0x4] ss:$0 sm:$0xff]  ;;  %v1758_v0 = vld [vmem:[%s1946_s15 + $0x5] ss:$0 sm:$0xff] }
  0x2c   : > { %v618_v6 = vsub.f32 1.0, %v617_v5  ;;  %885 = vmatpush.msrb.mxu2 %v1668_v28  ;;  %v1752_v46 = vld [vmem:[%s2193_s14] ss:$0 sm:$0xff]  ;;  %v1679_v18 = vld [vmem:[%s1937_s28 + $0x50] sm:$0xff]  ;;  %v1754_v19 = vld [vmem:[%s1946_s15 + $0x1] ss:$0 sm:$0xff] }
  0x2d   : > { %704 = vmatpush.msrb.mxu1 %v1640_v29  ;;  %v1659_v53 = vld [vmem:[%s1937_s28 + $0xa0] sm:$0xff]  ;;  %v1678_v20 = vld [vmem:[%s1937_s28 + $0x48] sm:$0xff] }
  0x2e   : > { %v619_v7 = vmul.f32 %v1771_v4, %v618_v6  ;;  %886 = vmatpush.msrb.mxu2 %v1667_v30  ;;  %v1753_v58 = vld [vmem:[%s1946_s15] ss:$0 sm:$0xff] }
  0x2f   : > { %705 = vmatpush.msrb.mxu1 %v1639_v32  ;;  %v1677_v22 = vld [vmem:[%s1937_s28 + $0x40] sm:$0xff] }
  0x30   : > { %v620_v8 = vadd.f32 %v1771_v4, %v619_v7  ;;  %887 = vmatpush.msrb.mxu2 %v1666_v33  ;;  %v802_v24 = vld [vmem:[%s2194_s2] sm:$0xff]  ;;  %v1686_v33 = vld [vmem:[%s1937_s28 + $0xd8] sm:$0xff] }
  0x31   : > { %706 = vmatpush.msrb.mxu1 %v1638_v35  ;;  %v1684_v35 = vld [vmem:[%s1937_s28 + $0xc8] sm:$0xff] }
  0x32   : > { %v1983_v9 = vsel %vm621_vm2, %v1771_v4, %v620_v8  ;;  %888 = vmatpush.msrb.mxu2 %v1665_v36  ;;  %v1683_v36 = vld [vmem:[%s1937_s28 + $0xc0] sm:$0xff] }
  0x9d   : > { %v615_v10 = vpop.xlane.xlu0 %614 }
  0x9e   : > { %v623_v11 = vmul.f32 %v1983_v9, %v615_v10 }
  0xa0   : > { %v624_v12 = vsub.f32 %v1979_v1, %v623_v11 }
  0xa2   : > { %v625_v13 = vmul.f32 %v624_v12, %v624_v12 }
  0xa4   : > { %v626_v14 = vsel %vm612_vm1, %v625_v13, 0.0 }
  0xa5   : > { %627 = vadd.xlane.f32.xlu0 %v626_v14 }
 0x118   : > { %v628_v31 = vpop.xlane.xlu0 %627 }
 0x119   : > { %v629_v34 = vmul.f32 %v628_v31, %v1983_v9 }
 0x11b   : > { %v630_v37 = vadd.f32 1e-05, %v629_v34  ;;  %v1685_v34 = vld [vmem:[%s1937_s28 + $0xd0] sm:$0xff] }
 0x11d   : > { %1772 = vrsqrt.f32 %v630_v37  ;;  %vm637_vm4 = vweird.f32 %v630_v37 }
 0x123   : > { %v1773_v38 = vpop.eup %1772 }
 0x124   : > { %v632_v39 = vmul.f32 %v1773_v38, %v630_v37  ;;  %vm638_vm3 = vweird.f32 %v1773_v38 }
 0x125   : > { %vm639_vm5 = vmor %vm637_vm4, %vm638_vm3 }
 0x126   : > { %v633_v40 = vmul.f32 %v1773_v38, %v632_v39 }
 0x128   : > { %v634_v41 = vmul.f32 0.5, %v633_v40  ;;  %v1674_v40 = vld [vmem:[%s2194_s2 + $0x8] sm:$0xff] }
 0x12a   : > { %v635_v42 = vsub.f32 1.5, %v634_v41  ;;  %v1692_v41 = vld [vmem:[%s1937_s28 + $0x158] sm:$0xff] }
 0x12c   : > { %v636_v43 = vmul.f32 %v1773_v38, %v635_v42  ;;  %v1691_v42 = vld [vmem:[%s1937_s28 + $0x150] sm:$0xff] }
 0x12e   : > { %v640_v45 = vsel %vm639_vm5, %v1773_v38, %v636_v43  ;;  %v1690_v43 = vld [vmem:[%s1937_s28 + $0x148] sm:$0xff] }
 0x12f   : > { %v641_v47 = vmul.f32 %v640_v45, %v624_v12  ;;  %v1703_v45 = vld [vmem:[%s1937_s28 + $0x78] sm:$0xff] }
 0x131   : > { %v645_v48 = vmul.f32 %v1751_v44, %v641_v47  ;;  %v1689_v44 = vld [vmem:[%s1937_s28 + $0x140] sm:$0xff]  ;;  %v1702_v47 = vld [vmem:[%s1937_s28 + $0x70] sm:$0xff] }
 0x133   : > { %v2019_v49 = vadd.f32 %v1752_v46, %v645_v48  ;;  %v1701_v48 = vld [vmem:[%s1937_s28 + $0x68] sm:$0xff] }
 0x135   : > { %1637 = vmatmul.msk.f32.vlgmr.msra.gmra.mxu1 %vm612_vm1, %v2019_v49  ;;  %1649 = vmatmul.msk.f32.vlgmr.msra.gmra.mxu2 %vm612_vm1, %v2019_v49 }
 0x136   : > { %1658 = vmatmul.msk.f32.vlgmr.msra.gmra.mxu0 %vm612_vm1, %v2019_v49  ;;  %855 = vmatpush.msra.mxu1 %v1662_v50  ;;  %v1760_v50 = vld [vmem:[%s1946_s15 + $0x6] ss:$0 sm:$0xff] }
 0x137   : > { %996 = vmatpush.msra.mxu2 %v802_v24  ;;  %v1762_v24 = vld [vmem:[%s1946_s15 + $0x3] ss:$0 sm:$0xff] }
 0x138   : > { %856 = vmatpush.msra.mxu1 %v1661_v51  ;;  %v1700_v51 = vld [vmem:[%s1937_s28 + $0x60] sm:$0xff] }
 0x13a   : > { %857 = vmatpush.msra.mxu1 %v1660_v52  ;;  %v1759_v52 = vld [vmem:[%s1946_s15 + $0x2] ss:$0 sm:$0xff] }
 0x13c   : > { %858 = vmatpush.msra.mxu1 %v1659_v53 }
 0x13d   : > { %1643 = vmatmul.msk.f32.vlgmr.msrb.gmra.mxu1 %vm612_vm1, %v2019_v49  ;;  %1670 = vmatmul.msk.f32.vlgmr.msrb.gmra.mxu2 %vm612_vm1, %v2019_v49 }
 0x13e   : > { %973 = vmatpush.msrb.mxu1 %v1674_v40 }
 0x145   : > { %1664 = vmatmul.msk.f32.vlgmr.msra.gmra.mxu1 %vm612_vm1, %v2019_v49 }
 0x146   : > { %1083 = vmatpush.msra.mxu1 %v1692_v41 }
 0x148   : > { %1084 = vmatpush.msra.mxu1 %v1691_v42 }
 0x14a   : > { %1085 = vmatpush.msra.mxu1 %v1690_v43 }
 0x14c   : > { %1086 = vmatpush.msra.mxu1 %v1689_v44 }
 0x1b2   : > { %v678_v54 = vpop.f32.mrf.mxu1 }
 0x1b3   : > { %v679_v63 = vadd.f32 %v1753_v58, %v678_v54  ;;  %v830_v21 = vpop.f32.mrf.mxu0  ;;  %v1708_v58 = vld [vmem:[%s1937_s28 + $0xf0] sm:$0xff] }
 0x1b4   : > { %v831_v23 = vadd.f32 %v1754_v19, %v830_v21  ;;  %v1712_v19 = vld [vmem:[%s1937_s28 + $0x160] sm:$0xff] }
 0x1b8   : > { %v738_v57 = vpop.f32.mrf.mxu2 }
 0x1b9   : > { %v739_v61 = vadd.f32 %v1755_v56, %v738_v57  ;;  %v1709_v56 = vld [vmem:[%s1937_s28 + $0xf8] sm:$0xff] }
 0x1ba   : > { %v708_v59 = vpop.f32.mrf.mxu1 }
 0x1bb   : > { %v709_v60 = vadd.f32 %v1756_v55, %v708_v59  ;;  %v1707_v59 = vld [vmem:[%s1937_s28 + $0xe8] sm:$0xff] }
 0x1bd   : > { %1650 = vmatpush.xpose.msk.msra.mxu3 %vm741_vm6, %v709_v60  ;;  %v1706_v60 = vld [vmem:[%s1937_s28 + $0xe0] sm:$0xff] }
 0x1c0   : > { %1651 = vmatmul.msk.f32.vlgmr.msra.gmra.mxu3 %vm741_vm6, %v679_v63  ;;  %v890_v2 = vpop.f32.mrf.mxu2 }
 0x1c1   : > { %797 = vmatpush.msrb.mxu3 %v739_v61  ;;  %v891_v3 = vadd.f32 %v1757_v62, %v890_v2  ;;  %v1698_v61 = vld [vmem:[%s2194_s2 + $0x10] sm:$0xff]  ;;  %v1761_v2 = vld [vmem:[%s1946_s15 + $0xa] ss:$0 sm:$0xff] }
 0x1c2   : > { %v860_v4 = vpop.f32.mrf.mxu1 }
 0x1c3   : > { %v861_v5 = vadd.f32 %v1758_v0, %v860_v4  ;;  %948 = vmatpush.msrb.mxu0 %v891_v3 }
 0x1c5   : > { %1671 = vmatpush.xpose.msk.msra.mxu3 %vm741_vm6, %v861_v5  ;;  %1053 = vmatpush.msra.mxu0 %v1686_v33 }
 0x1c7   : > { %1054 = vmatpush.msra.mxu0 %v1685_v34 }
 0x1c9   : > { %1055 = vmatpush.msra.mxu0 %v1684_v35 }
 0x1cb   : > { %1056 = vmatpush.msra.mxu0 %v1683_v36 }
 0x243   : > { %v765_v6 = vpop.f32.mrf.mxu3 }
 0x244   : > { %v768_v7 = vsel %vm741_vm6, %v765_v6, -inf }
 0x245   : > { %769 = vmax.xlane.f32.xlu1 %v768_v7  ;;  %v1763_v7 = vld [vmem:[%s1946_s15 + $0x7] ss:$0 sm:$0xff] }
 0x2b8   : > { %v770_v8 = vpop.xlane.xlu1 %769 }
 0x2b9   : > { %v771_v10 = vsub.f32 %v765_v6, %v770_v8 }
 0x2bb   : > { %v772_v11 = vmul.f32 1.442695, %v771_v10 }
 0x2bd   : > { %1774 = vpow2.f32 %v772_v11 }
 0x2c3   : > { %v1775_v12 = vpop.eup %1774 }
 0x2c4   : > { %v774_v13 = vsel %vm741_vm6, %v1775_v12, 0.0 }
 0x2c5   : > { %775 = vadd.xlane.f32.xlu1 %v774_v13 }
 0x338   : > { %v776_v14 = vpop.xlane.xlu1 %775 }
 0x339   : > { %1776 = vrcp.f32 %v776_v14 }
 0x33f   : > { %v1777_v15 = vpop.eup %1776 }
 0x340   : > { %v778_v16 = vmul.f32 %v1777_v15, %v1775_v12 }
 0x342   : > { %1652 = vmatmul.msk.f32.vlgmr.msrb.gmra.mxu3 %vm741_vm6, %v778_v16  ;;  %v1715_v16 = vld [vmem:[%s1937_s28 + $0x178] sm:$0xff] }
 0x343   : > { %1023 = vmatpush.msrb.mxu3 %v1680_v17  ;;  %v1714_v17 = vld [vmem:[%s1937_s28 + $0x170] sm:$0xff] }
 0x345   : > { %1024 = vmatpush.msrb.mxu3 %v1679_v18  ;;  %v1713_v18 = vld [vmem:[%s1937_s28 + $0x168] sm:$0xff] }
 0x347   : > { %1025 = vmatpush.msrb.mxu3 %v1678_v20 }
 0x349   : > { %1026 = vmatpush.msrb.mxu3 %v1677_v22 }
 0x34a   : > { %1672 = vmatmul.msk.f32.vlgmr.msra.gmra.mxu3 %vm741_vm6, %v831_v23 }
 0x352   : > { %1682 = vmatmul.msk.f32.vlgmr.msrb.gmra.mxu3 %vm612_vm1, %v2019_v49 }
 0x3c5   : > { %v799_v25 = vpop.f32.mrf.mxu3 }
 0x3c6   : > { %1676 = vmatmul.msk.f32.vlgmr.msra.gmra.mxu2 %vm741_vm6, %v799_v25 }
 0x3cd   : > { %v916_v26 = vpop.f32.mrf.mxu3 }
 0x3ce   : > { %v919_v27 = vsel %vm741_vm6, %v916_v26, -inf }
 0x3cf   : > { %920 = vmax.xlane.f32.xlu2 %v919_v27 }
 0x3d5   : > { %v1028_v54 = vpop.f32.mrf.mxu3 }
 0x3d6   : > { %v1029_v57 = vadd.f32 %v1759_v52, %v1028_v54 }
 0x442   : > { %v921_v28 = vpop.xlane.xlu2 %920 }
 0x443   : > { %v922_v29 = vsub.f32 %v916_v26, %v921_v28  ;;  %v1764_v26 = vld [vmem:[%s1946_s15 + $0xb] ss:$0 sm:$0xff] }
 0x445   : > { %v923_v30 = vmul.f32 1.442695, %v922_v29 }
 0x447   : > { %1778 = vpow2.f32 %v923_v30 }
 0x449   : > { %v998_v62 = vpop.f32.mrf.mxu2 }
 0x44d   : > { %v1779_v31 = vpop.eup %1778 }
 0x44e   : > { %v925_v32 = vsel %vm741_vm6, %v1779_v31, 0.0 }
 0x44f   : > { %926 = vadd.xlane.f32.xlu2 %v925_v32 }
 0x4c2   : > { %v927_v37 = vpop.xlane.xlu2 %926 }
 0x4c3   : > { %1780 = vrcp.f32 %v927_v37 }
 0x4c9   : > { %v1781_v38 = vpop.eup %1780 }
 0x4ca   : > { %v929_v39 = vmul.f32 %v1781_v38, %v1779_v31  ;;  %v1721_v38 = vld [vmem:[%s2194_s2 + $0x18] sm:$0xff] }
 0x4cc   : > { %1673 = vmatmul.msk.f32.vlgmr.msrb.gmra.mxu0 %vm741_vm6, %v929_v39 }
 0x4cd   : > { %1171 = vmatpush.msrb.mxu0 %v1698_v61 }
 0x4d4   : > { %1688 = vmatmul.msk.f32.vlgmr.msra.gmra.mxu0 %vm612_vm1, %v2019_v49 }
 0x549   : > { %v950_v46 = vpop.f32.mrf.mxu0 }
 0x54a   : > { %1675 = vmatmul.msk.f32.vlgmr.msrb.gmra.mxu1 %vm741_vm6, %v950_v46 }
 0x54b   : > { %1199 = vmatpush.msrb.mxu1 %v1703_v45  ;;  %v1765_v45 = vld [vmem:[%s2195_s16] ss:$0 sm:$0xff] }
 0x54d   : > { %1200 = vmatpush.msrb.mxu1 %v1702_v47 }
 0x54f   : > { %1201 = vmatpush.msrb.mxu1 %v1701_v48 }
 0x551   : > { %v1058_v53 = vpop.f32.mrf.mxu0  ;;  %1202 = vmatpush.msrb.mxu1 %v1700_v51 }
 0x552   : > { %v1059_v55 = vadd.f32 %v1760_v50, %v1058_v53  ;;  %1694 = vmatmul.msk.f32.vlgmr.msra.gmra.mxu1 %vm612_vm1, %v2019_v49 }
 0x554   : > { %1695 = vmatpush.xpose.msk.msrb.mxu2 %vm741_vm6, %v1059_v55  ;;  %v1394_v55 = vld [vmem:[%s1959_s24 + $0x18] sm:$0xff] }
 0x557   : > { %1696 = vmatmul.msk.f32.vlgmr.msrb.gmra.mxu2 %vm741_vm6, %v1029_v57  ;;  %v1391_v57 = vld [vmem:[%s1959_s24] sm:$0xff] }
 0x558   : > { %1229 = vmatpush.msra.mxu2 %v1709_v56  ;;  %v1393_v56 = vld [vmem:[%s1959_s24 + $0x10] sm:$0xff] }
 0x55a   : > { %1230 = vmatpush.msra.mxu2 %v1708_v58  ;;  %1705 = vmatmul.msk.f32.vlgmr.msrb.gmra.mxu1 %vm612_vm1, %v2019_v49  ;;  %v1430_v58 = vld [vmem:[%s1969_s3 + $0x38] sm:$0xff] }
 0x55c   : > { %1231 = vmatpush.msra.mxu2 %v1707_v59  ;;  %v1429_v59 = vld [vmem:[%s1969_s3 + $0x30] sm:$0xff] }
 0x55e   : > { %1232 = vmatpush.msra.mxu2 %v1706_v60  ;;  %v1428_v60 = vld [vmem:[%s1969_s3 + $0x28] sm:$0xff] }
 0x55f   : > { %1711 = vmatmul.msk.f32.vlgmr.msra.gmra.mxu2 %vm612_vm1, %v2019_v49 }
 0x560   : > { %1347 = vmatpush.msrb.mxu2 %v1721_v38 }
 0x5c7   : > { %v975_v63 = vpop.f32.mrf.mxu1 }
 0x5c8   : > { %v999_v0 = vadd.f32 %v998_v62, %v975_v63  ;;  %v1427_v63 = vld [vmem:[%s1969_s3 + $0x20] sm:$0xff] }
 0x5cf   : > { %v1088_v3 = vpop.f32.mrf.mxu1 }
 0x5d0   : > { %v1089_v4 = vadd.f32 %v1761_v2, %v1088_v3  ;;  %v1426_v2 = vld [vmem:[%s1969_s3 + $0x18] sm:$0xff] }
 0x5d2   : > { %1146 = vmatpush.msra.mxu3 %v1089_v4 }
 0x5d4   : > { %1259 = vmatpush.msrb.mxu3 %v1715_v16  ;;  %v1424_v16 = vld [vmem:[%s1969_s3 + $0x8] sm:$0xff] }
 0x5d6   : > { %1260 = vmatpush.msrb.mxu3 %v1714_v17  ;;  %v1423_v17 = vld [vmem:[%s1969_s3] sm:$0xff] }
 0x5d7   : > { %v1204_v25 = vpop.f32.mrf.mxu1 }
 0x5d8   : > { %1261 = vmatpush.msrb.mxu3 %v1713_v18  ;;  %v1205_v27 = vadd.f32 %v1762_v24, %v1204_v25  ;;  %v1768_v18 = vld [vmem:[%s593_s30] ss:$0 sm:$0xff] }
 0x5da   : > { %v1114_v5 = vpop.f32.mrf.mxu2  ;;  %1262 = vmatpush.msrb.mxu3 %v1712_v19 }
 0x5db   : > { %v1117_v6 = vsel %vm741_vm6, %v1114_v5, -inf }
 0x5dc   : > { %1118 = vmax.xlane.f32.xlu0 %v1117_v6 }
 0x5e2   : > { %v1234_v8 = vpop.f32.mrf.mxu2 }
 0x5e3   : > { %v1235_v10 = vadd.f32 %v1763_v7, %v1234_v8 }
 0x5e5   : > { %1718 = vmatpush.xpose.msk.msra.mxu0 %vm741_vm6, %v1235_v10 }
 0x64f   : > { %v1119_v11 = vpop.xlane.xlu0 %1118 }
 0x650   : > { %v1120_v12 = vsub.f32 %v1114_v5, %v1119_v11 }
 0x652   : > { %v1121_v13 = vmul.f32 1.442695, %v1120_v12  ;;  %v1767_v12 = vld [vmem:[%s585_s22] ss:$0 sm:$0xff] }
 0x654   : > { %1782 = vpow2.f32 %v1121_v13 }
 0x65a   : > { %v1783_v14 = vpop.eup %1782 }
 0x65b   : > { %v1123_v15 = vsel %vm741_vm6, %v1783_v14, 0.0 }
 0x65c   : > { %1124 = vadd.xlane.f32.xlu1 %v1123_v15  ;;  %v1425_v15 = vld [vmem:[%s1969_s3 + $0x10] sm:$0xff] }
 0x6cf   : > { %v1125_v20 = vpop.xlane.xlu1 %1124 }
 0x6d0   : > { %1784 = vrcp.f32 %v1125_v20 }
 0x6d6   : > { %v1785_v21 = vpop.eup %1784 }
 0x6d7   : > { %v1127_v22 = vmul.f32 %v1785_v21, %v1783_v14 }
 0x6d9   : > { %1697 = vmatmul.msk.f32.vlgmr.msra.gmra.mxu3 %vm741_vm6, %v1127_v22  ;;  %v1769_v22 = vld [vmem:[%s601_s5] ss:$0 sm:$0xff] }
 0x6da   : > { %1414 = vmatpush.msra.mxu3 %v1394_v55 }
 0x6dc   : > { %1415 = vmatpush.msra.mxu3 %v1393_v56 }
 0x6e1   : > { %1717 = vmatmul.msk.f32.vlgmr.msrb.gmra.mxu3 %vm612_vm1, %v2019_v49 }
 0x75c   : > { %v1148_v23 = vpop.f32.mrf.mxu3 }
 0x75d   : > { %1699 = vmatmul.msk.f32.vlgmr.msrb.gmra.mxu0 %vm741_vm6, %v1148_v23 }
 0x75e   : > { %1447 = vmatpush.msrb.mxu0 %v1430_v58 }
 0x760   : > { %1448 = vmatpush.msrb.mxu0 %v1429_v59 }
 0x762   : > { %1449 = vmatpush.msrb.mxu0 %v1428_v60 }
 0x764   : > { %v1264_v28 = vpop.f32.mrf.mxu3  ;;  %1450 = vmatpush.msrb.mxu0 %v1427_v63 }
 0x765   : > { %v1265_v29 = vadd.f32 %v1764_v26, %v1264_v28  ;;  %1719 = vmatmul.msk.f32.vlgmr.msra.gmra.mxu0 %vm741_vm6, %v1205_v27 }
 0x766   : > { %1451 = vmatpush.msrb.mxu0 %v1426_v2 }
 0x767   : > { %1322 = vmatpush.msra.mxu1 %v1265_v29 }
 0x768   : > { %1452 = vmatpush.msrb.mxu0 %v1425_v15 }
 0x76a   : > { %1453 = vmatpush.msrb.mxu0 %v1424_v16 }
 0x76c   : > { %1454 = vmatpush.msrb.mxu0 %v1423_v17 }
 0x7da   : > { %v1173_v30 = vpop.f32.mrf.mxu0 }
 0x7db   : > { %v1176_v31 = vadd.f32 %v1173_v30, %v999_v0 }
 0x7e2   : > { %v1290_v32 = vpop.f32.mrf.mxu0 }
 0x7e3   : > { %v1293_v33 = vsel %vm741_vm6, %v1290_v32, -inf }
 0x7e4   : > { %1294 = vmax.xlane.f32.xlu2 %v1293_v33 }
 0x857   : > { %v1295_v49 = vpop.xlane.xlu2 %1294 }
 0x858   : > { %v1296_v34 = vsub.f32 %v1290_v32, %v1295_v49 }
 0x85a   : > { %v1297_v35 = vmul.f32 1.442695, %v1296_v34 }
 0x85c   : > { %1786 = vpow2.f32 %v1297_v35 }
 0x862   : > { %v1787_v36 = vpop.eup %1786 }
 0x863   : > { %v1299_v37 = vsel %vm741_vm6, %v1787_v36, 0.0 }
 0x864   : > { %1300 = vadd.xlane.f32.xlu0 %v1299_v37 }
 0x8d7   : > { %v1301_v39 = vpop.xlane.xlu0 %1300 }
 0x8d8   : > { %1788 = vrcp.f32 %v1301_v39 }
 0x8de   : > { %v1789_v40 = vpop.eup %1788 }
 0x8df   : > { %v1303_v41 = vmul.f32 %v1789_v40, %v1787_v36 }
 0x8e1   : > { %1720 = vmatmul.msk.f32.vlgmr.msra.gmra.mxu1 %vm741_vm6, %v1303_v41 }
 0x95e   : > { %v1324_v42 = vpop.f32.mrf.mxu1 }
 0x95f   : > { %1722 = vmatmul.msk.f32.vlgmr.msrb.gmra.mxu2 %vm741_vm6, %v1324_v42 }
 0x9e2   : > { %v1349_v43 = vpop.f32.mrf.mxu2 }
 0x9e3   : > { %v1352_v44 = vadd.f32 %v1349_v43, %v1176_v31 }
 0x9e5   : > { %v1353_v46 = vadd.f32 %v1352_v44, %v1979_v1  ;;  %v1392_v1 = vld [vmem:[%s1959_s24 + $0x8] sm:$0xff] }
 0x9e6   : > { %1416 = vmatpush.msra.mxu3 %v1392_v1 }
 0x9e7   : > { %v1358_v47 = vadd.f32 %v1765_v45, %v1353_v46 }
 0x9e8   : > { %1417 = vmatpush.msra.mxu3 %v1391_v57 }
 0x9e9   : > { %v1361_v48 = vsel %vm612_vm1, %v1358_v47, 0.0 }
 0x9ea   : > { %1362 = vadd.xlane.f32.xlu1 %v1361_v48 }
 0xa5d   : > { %v1363_v50 = vpop.xlane.xlu1 %1362 }
 0xa5e   : > { %v1364_v51 = vmul.f32 %v1363_v50, %v1983_v9 }
 0xa60   : > { %v1365_v52 = vsub.f32 %v1358_v47, %v1364_v51 }
 0xa62   : > { %v1366_v53 = vmul.f32 %v1365_v52, %v1365_v52 }
 0xa64   : > { %v1367_v54 = vsel %vm612_vm1, %v1366_v53, 0.0 }
 0xa65   : > { %1368 = vadd.xlane.f32.xlu2 %v1367_v54 }
 0xad8   : > { %v1369_v61 = vpop.xlane.xlu2 %1368 }
 0xad9   : > { %v1370_v62 = vmul.f32 %v1369_v61, %v1983_v9  ;;  %v1766_v9 = vld [vmem:[%s582_s20] ss:$0 sm:$0xff] }
 0xadb   : > { %v1371_v0 = vadd.f32 1e-05, %v1370_v62 }
 0xadd   : > { %1790 = vrsqrt.f32 %v1371_v0  ;;  %vm1378_vm8 = vweird.f32 %v1371_v0 }
 0xae3   : > { %v1791_v3 = vpop.eup %1790 }
 0xae4   : > { %v1373_v4 = vmul.f32 %v1791_v3, %v1371_v0  ;;  %vm1379_vm7 = vweird.f32 %v1791_v3 }
 0xae5   : > { %vm1380_vm9 = vmor %vm1378_vm8, %vm1379_vm7 }
 0xae6   : > { %v1374_v5 = vmul.f32 %v1791_v3, %v1373_v4 }
 0xae8   : > { %v1375_v6 = vmul.f32 0.5, %v1374_v5 }
 0xaea   : > { %v1376_v7 = vsub.f32 1.5, %v1375_v6 }
 0xaec   : > { %v1377_v8 = vmul.f32 %v1791_v3, %v1376_v7 }
 0xaee   : > { %v1381_v10 = vsel %vm1380_vm9, %v1791_v3, %v1377_v8 }
 0xaef   : > { %v1382_v11 = vmul.f32 %v1381_v10, %v1365_v52 }
 0xaf1   : > { %v1386_v13 = vmul.f32 %v1766_v9, %v1382_v11 }
 0xaf3   : > { %v1390_v14 = vadd.f32 %v1767_v12, %v1386_v13 }
 0xaf5   : > { %1723 = vmatmul.msk.f32.vlgmr.msra.gmra.mxu3 %vm612_vm1, %v1390_v14 }
 0xb78   : > { %v1419_v19 = vpop.f32.mrf.mxu3 }
 0xb79   : > { %v1420_v20 = vadd.f32 %v1768_v18, %v1419_v19 }
 0xb7b   : > { %v1422_v21 = vmax.f32 %v1420_v20, 0.0 }
 0xb7d   : > { %1724 = vmatmul.msk.f32.vlgmr.msrb.gmra.mxu0 %vm1435_vm10, %v1422_v21 }
 0xbfa   : > { %v1456_v23 = vpop.f32.mrf.mxu0 }
 0xbfb   : > { %v1457_v24 = vadd.f32 %v1769_v22, %v1456_v23  ;;  %1464 = sbr.rel (%p1725_p5) target bundleno = 3073 (0xc01), region = 80 }
 0xbfd   : > { %v1459_v25 = vadd.f32 %v1457_v24, %v1358_v47 }
 0xbff   : > { %1460 = vst.msk [vmem:[#allocation2] sm:$0xff] %vm612_vm1, %v1459_v25 }
 0xc00   : > { %1465 = vst.msk [vmem:[#allocation3] sm:$0xff] %vm612_vm1, %v1459_v25 }
 0xc01 PF: > { %p1739_p6 = scmp.eq.s32.totalorder %s1910_s26, 1  ;;  %s1833_s3 = smov [#allocation3]  }
 0xc02   : > { %s1472_s30 = sshll.u32 %s1833_s3, 4  ;;  %s2196_s19 = sld [smem:[#allocation11_spill]]  ;;  %s1473_s30 = int_to_ptr.vmem [resolvable:$true] %s1472_s30 }
 0xc08   : > { %s1474_s27 = sshll.u32 %s2196_s19, 4  ;;  %s1475_s27 = int_to_ptr.hbm [resolvable:$true] %s1474_s27 }
 0xc09   : > { %1736 = dma.vmem_to_hbm [thread:$0]  (%p1739_p6), %s1473_s30, 128, %s1475_s27, [#allocation4]  }
 0xc0a   : > { %1825 = dma.done.wait (%p1739_p6), [#allocation4], 128  }
 0xc0b   : > { %1827 = vsyncadd (%p1739_p6), [#allocation4], 4294967168 }
 0xc0c PF: > { %s2197_s5 = sld [smem:[#allocation6_spill]] }
 0xc12   : > { %s24_s25 = sadd.s32 1, %s2197_s5  }
 0xc13   : > { %p21_p7 = scmp.ge.s32.totalorder %s24_s25, 4  }
 0xc15   :  { %23 = sbr.rel (!%p21_p7) target bundleno = 6 (0x6), region = 165 }
 0xc1a   :  { %1488 = vsyncpa [#allocation4], 1 }
 0xc1b   :  { %1490 = vsyncpa [#allocation4 + $0x1], 1 }

</bundles_post_ra>
